<compile_context>
chip_gen: v6e
topology: v6e:2x2x1
jax: 0.10.0
libtpu: 0.0.40
codegen_flags: <defaults>
</compile_context>

<pallas_src>
import functools

import jax
import jax.numpy as jnp
from jax import lax
from jax.experimental import pallas as pl
from jax.experimental.pallas import tpu as pltpu


# ---------------------------------------------------------------------------
# Pallas kernel: (affine) -> act_in -> bf16 matmul (f32 acc) -> +bias ->
#                act_out   (+ optional masked per-tile column sum/sumsq)
# ---------------------------------------------------------------------------
def _apply_act(x, kind):
    if kind == "leaky":
        return jnp.maximum(x, 0.2 * x)
    if kind == "tanh":
        return jnp.tanh(x)
    return x


def _stage_kernel(*refs, in_act, out_act, affine, with_stats, rows, row_tile,
                  need_mask):
    idx = 0
    x_ref = refs[idx]; idx += 1
    if affine:
        scale_ref = refs[idx]; shift_ref = refs[idx + 1]; idx += 2
    w_ref = refs[idx]; b_ref = refs[idx + 1]; idx += 2
    o_ref = refs[idx]; idx += 1
    stats_ref = refs[idx] if with_stats else None

    x = x_ref[...]
    if affine or in_act != "none":
        xf = x.astype(jnp.float32)                 # f32 elementwise prologue
        if affine:
            xf = xf * scale_ref[...] + shift_ref[...]
        xf = _apply_act(xf, in_act)
        x = xf.astype(jnp.bfloat16)
    # bf16 operands -> f32 accumulate on the MXU
    y = jnp.dot(x, w_ref[...], preferred_element_type=jnp.float32) + b_ref[...]
    o_ref[...] = _apply_act(y, out_act).astype(o_ref.dtype)

    if with_stats:
        ym = y
        if need_mask:   # zero padded rows so they don't pollute BN stats
            row0 = pl.program_id(0) * row_tile
            rid = lax.broadcasted_iota(jnp.int32, (y.shape[0], 1), 0) + row0
            ym = y * (rid < rows).astype(jnp.float32)
        stats_ref[...] = jnp.concatenate(
            [jnp.sum(ym, axis=0, keepdims=True),
             jnp.sum(ym * ym, axis=0, keepdims=True)], axis=0)


# ---------------------------------------------------------------------------
# Tiling helpers
# ---------------------------------------------------------------------------
def _pick_row_tile(rp, row_tile):
    """Biggest tile <= row_tile, preferring one that divides rp (no pad/mask)."""
    if rp <= row_tile:
        return rp                                  # single step: block == full dims
    for step in (16, 8):                           # prefer multiples of 16 (bf16 tiles)
        tr = (row_tile // step) * step
        while tr >= step:
            if rp % tr == 0:
                return tr
            tr -= step
    return (row_tile // 8) * 8                     # fall back: pad + mask


def _pick_pack(rows, k, n, kt=128, nt=256, max_pack=8, max_dim=2048):
    """Row-pack factor p (power of 2 dividing rows) so p*k >= kt and p*n >= nt."""
    p = 1
    while (p < max_pack and (p * k < kt or p * n < nt)
           and rows % (2 * p) == 0 and 2 * p * max(k, n) <= max_dim):
        p *= 2
    return p


def _compute_packs(rows, C):
    return {"p1": _pick_pack(rows, 16 * C, 256),
            "p2": _pick_pack(rows, 256, 128),
            "p3": _pick_pack(rows, 128, 256),
            "p4": _pick_pack(rows, 256, 16 * C)}


# ---------------------------------------------------------------------------
# Fused stage wrapper
# ---------------------------------------------------------------------------
def fused_stage(x, w, b, *, scale=None, shift=None, in_act="none",
                out_act="none", want_stats=False, out_dtype=jnp.bfloat16,
                row_tile=1024):
    """out = act_out( act_in(x*scale+shift) @ w + b ); optional fused column
    sum/sumsq stats (for BatchNorm). Returns (out, stats_or_None)."""
    R, K = x.shape
    Kw, Np = w.shape
    assert K == Kw and b.shape == (1, Np)
    affine = scale is not None

    tr = _pick_row_tile(R, row_tile)
    T = pl.cdiv(R, tr)
    R_pad = T * tr
    need_mask = R_pad != R
    xin = x.astype(jnp.bfloat16)
    if need_mask:
        xin = jnp.pad(xin, ((0, R_pad - R), (0, 0)))

    kernel = functools.partial(
        _stage_kernel, in_act=in_act, out_act=out_act, affine=affine,
        with_stats=want_stats, rows=R, row_tile=tr, need_mask=need_mask)

    in_specs = [pl.BlockSpec((tr, K), lambda i: (i, 0))]
    inputs = [xin]
    if affine:
        in_specs += [pl.BlockSpec((1, K), lambda i: (0, 0)),
                     pl.BlockSpec((1, K), lambda i: (0, 0))]
        inputs += [scale.reshape(1, K).astype(jnp.float32),
                   shift.reshape(1, K).astype(jnp.float32)]
    in_specs += [pl.BlockSpec((K, Np), lambda i: (0, 0)),
                 pl.BlockSpec((1, Np), lambda i: (0, 0))]
    inputs += [w.astype(jnp.bfloat16), b.astype(jnp.float32)]

    out_shapes = [jax.ShapeDtypeStruct((R_pad, Np), out_dtype)]
    out_specs = [pl.BlockSpec((tr, Np), lambda i: (i, 0))]
    if want_stats:
        # per-tile partial sums -> keeps the row axis 'parallel' (megacore)
        out_shapes.append(jax.ShapeDtypeStruct((T, 2, Np), jnp.float32))
        out_specs.append(pl.BlockSpec((None, 2, Np), lambda i: (i, 0, 0)))

    outs = pl.pallas_call(
        kernel,
        out_shape=tuple(out_shapes),
        grid=(T,),
        in_specs=in_specs,
        out_specs=tuple(out_specs),
        compiler_params=pltpu.CompilerParams(
            dimension_semantics=("parallel",),
            vmem_limit_bytes=32 * 1024 * 1024),
    )(*inputs)

    out = outs[0][:R] if need_mask else outs[0]
    stats = outs[1].sum(axis=0) if want_stats else None
    return out, stats


# ---------------------------------------------------------------------------
# One-time parameter packing (hoisted out of the jitted forward)
# ---------------------------------------------------------------------------
def prepare_params(p, channels, N, H, W):
    """Pack the conv weights into block-row matmul form: bf16 block-diagonal
    (kron) weights + f32 bias rows matched to the per-stage pack factors."""
    C = channels
    assert H % 4 == 0 and W % 4 == 0
    R = N * (H // 4) * (W // 4)
    pk = _compute_packs(R, C)

    def blockdiag(m, reps):
        return jnp.kron(jnp.eye(reps, dtype=m.dtype), m)

    # column/row orderings match the block layout (a, b, c, dh, dw)
    w1m = p["w1"].reshape(64, C * 4).T                        # (c,dh,dw) -> co
    w2m = p["w2"].transpose(2, 3, 1, 0).reshape(64 * 4, 128)  # (a,b,c1) -> c2
    w3m = p["w3"].transpose(0, 2, 3, 1).reshape(128, 64 * 4)  # c1 -> (a,b,c2)
    w4m = p["w4"].reshape(64, C * 4)                          # co -> (c,dh,dw)

    prep = {
        "w1": blockdiag(w1m, 4 * pk["p1"]).astype(jnp.bfloat16),
        "b1": jnp.tile(p["b1"], 4 * pk["p1"]).reshape(1, -1).astype(jnp.float32),
        "w2": blockdiag(w2m, pk["p2"]).astype(jnp.bfloat16),
        "b2": jnp.tile(p["b2"], pk["p2"]).reshape(1, -1).astype(jnp.float32),
        "w3": blockdiag(w3m, pk["p3"]).astype(jnp.bfloat16),
        "b3": jnp.tile(p["b3"], 4 * pk["p3"]).reshape(1, -1).astype(jnp.float32),
        "w4": blockdiag(w4m, 4 * pk["p4"]).astype(jnp.bfloat16),
        "b4": jnp.tile(jnp.repeat(p["b4"], 4),
                       4 * pk["p4"]).reshape(1, -1).astype(jnp.float32),
        "g1": p["g1"].astype(jnp.float32), "be1": p["be1"].astype(jnp.float32),
        "g2": p["g2"].astype(jnp.float32), "be2": p["be2"].astype(jnp.float32),
    }
    return prep


# ---------------------------------------------------------------------------
# Forward pass (Pallas)
# ---------------------------------------------------------------------------
def make_forward(channels, N, H, W, row_tile=1024):
    C = channels
    assert H % 4 == 0 and W % 4 == 0
    H2, W2 = H // 4, W // 4
    R = N * H2 * W2
    pk = _compute_packs(R, C)
    p1, p2, p3, p4 = pk["p1"], pk["p2"], pk["p3"], pk["p4"]
    eps = 1e-5

    @jax.jit
    def forward(x_nchw, prep):
        # TODO(synk): ngpu>1 nn.parallel.data_parallel branch is pure device
        # placement; single-TPU path implemented.
        # NCHW -> block rows: row=(n,i,j) = one 4x4 block, cols=(a,b,c,dh,dw).
        x = (x_nchw.astype(jnp.bfloat16)
             .reshape(N, C, H2, 2, 2, W2, 2, 2)
             .transpose(0, 2, 5, 3, 6, 1, 4, 7)
             .reshape(R, 16 * C))

        # --- Conv2d(C,64,k2,s2) + LeakyReLU(0.2) ----------------------------
        y1, _ = fused_stage(x.reshape(R // p1, p1 * 16 * C),
                            prep["w1"], prep["b1"], out_act="leaky",
                            row_tile=row_tile)

        # --- Conv2d(64,128,k2,s2) + fused BN1 batch stats -------------------
        z2, st1 = fused_stage(y1.reshape(R // p2, p2 * 256),
                              prep["w2"], prep["b2"], want_stats=True,
                              row_tile=row_tile)
        st1 = st1.reshape(2, p2, 128).sum(axis=1)
        mean1 = st1[0] / R
        var1 = jnp.maximum(st1[1] / R - mean1 * mean1, 0.0)
        sc1 = prep["g1"] * lax.rsqrt(var1 + eps)
        sh1 = prep["be1"] - mean1 * sc1

        # --- BN1 -> LeakyReLU -> ConvTranspose2d(128,64) + fused BN2 stats --
        u3, st2 = fused_stage(z2.reshape(R // p3, p3 * 128),
                              prep["w3"], prep["b3"],
                              scale=jnp.tile(sc1, p3), shift=jnp.tile(sh1, p3),
                              in_act="leaky", want_stats=True,
                              row_tile=row_tile)
        st2 = st2.reshape(2, p3 * 4, 64).sum(axis=1)
        cnt2 = R * 4
        mean2 = st2[0] / cnt2
        var2 = jnp.maximum(st2[1] / cnt2 - mean2 * mean2, 0.0)
        sc2 = prep["g2"] * lax.rsqrt(var2 + eps)
        sh2 = prep["be2"] - mean2 * sc2

        # --- BN2 -> LeakyReLU -> ConvTranspose2d(64,C) -> Tanh (f32 out) ----
        o4, _ = fused_stage(u3.reshape(R // p4, p4 * 256),
                            prep["w4"], prep["b4"],
                            scale=jnp.tile(sc2, 4 * p4),
                            shift=jnp.tile(sh2, 4 * p4),
                            in_act="leaky", out_act="tanh",
                            out_dtype=jnp.float32, row_tile=row_tile)

        # block rows -> NCHW
        out = (o4.reshape(N, H2, W2, 2, 2, C, 2, 2)
                 .transpose(0, 5, 1, 3, 6, 2, 4, 7)
                 .reshape(N, C, H, W))
        return out

    return forward


# ---------------------------------------------------------------------------
# Parameters (deterministic, PyTorch-default-style shapes/init)
# ---------------------------------------------------------------------------
def init_params(key, channels):
    ks = jax.random.split(key, 8)

    def u(k, shape, fan_in):
        bound = 1.0 / jnp.sqrt(jnp.float32(fan_in))
        return jax.random.uniform(k, shape, jnp.float32, -bound, bound)

    p = {
        # Conv2d(C, 64, k=2, s=2): weight (out, in, kh, kw)
        "w1": u(ks[0], (64, channels, 2, 2), channels * 4),
        "b1": u(ks[1], (64,), channels * 4),
        # Conv2d(64, 128, k=2, s=2)
        "w2": u(ks[2], (128, 64, 2, 2), 64 * 4),
        "b2": u(ks[3], (128,), 64 * 4),
        # ConvTranspose2d(128, 64, k=2, s=2): weight (in, out, kh, kw)
        "w3": u(ks[4], (128, 64, 2, 2), 64 * 4),
        "b3": u(ks[5], (64,), 64 * 4),
        # ConvTranspose2d(64, C, k=2, s=2)
        "w4": u(ks[6], (64, channels, 2, 2), channels * 4),
        "b4": u(ks[7], (channels,), channels * 4),
        # BatchNorm2d affine params (PyTorch init: gamma=1, beta=0)
        "g1": jnp.ones((128,), jnp.float32), "be1": jnp.zeros((128,), jnp.float32),
        "g2": jnp.ones((64,), jnp.float32), "be2": jnp.zeros((64,), jnp.float32),
    }
    return p


# ---------------------------------------------------------------------------
# Pure-JAX (lax.conv) reference for sanity check
# ---------------------------------------------------------------------------
def ref_forward(x, p, eps=1e-5):
    def leaky(v):
        return jnp.where(v >= 0, v, 0.2 * v)

    def bn(v, g, b):
        mean = v.mean(axis=(0, 2, 3), keepdims=True)
        var = ((v - mean) ** 2).mean(axis=(0, 2, 3), keepdims=True)
        return (v - mean) * lax.rsqrt(var + eps) * g[None, :, None, None] + b[None, :, None, None]

    dn = ("NCHW", "OIHW", "NCHW")
    y = lax.conv_general_dilated(x, p["w1"], (2, 2), "VALID",
                                 dimension_numbers=dn) + p["b1"][None, :, None, None]
    y = leaky(y)
    y = lax.conv_general_dilated(y, p["w2"], (2, 2), "VALID",
                                 dimension_numbers=dn) + p["b2"][None, :, None, None]
    y = leaky(bn(y, p["g1"], p["be1"]))
    wt3 = jnp.transpose(p["w3"][:, :, ::-1, ::-1], (1, 0, 2, 3))
    y = lax.conv_general_dilated(y, wt3, (1, 1), ((1, 1), (1, 1)), lhs_dilation=(2, 2),
                                 dimension_numbers=dn) + p["b3"][None, :, None, None]
    y = leaky(bn(y, p["g2"], p["be2"]))
    wt4 = jnp.transpose(p["w4"][:, :, ::-1, ::-1], (1, 0, 2, 3))
    y = lax.conv_general_dilated(y, wt4, (1, 1), ((1, 1), (1, 1)), lhs_dilation=(2, 2),
                                 dimension_numbers=dn) + p["b4"][None, :, None, None]
    return jnp.tanh(y)


if __name__ == "__main__":
    key = jax.random.PRNGKey(0)
    k_param, k_x = jax.random.split(key)

    N, C, H, W = 2, 4, 16, 16          # small NCHW input (H, W divisible by 4)
    params = init_params(k_param, C)
    x = jax.random.normal(k_x, (N, C, H, W), jnp.float32)

    prep = prepare_params(params, C, N, H, W)      # one-time weight packing
    forward = make_forward(C, N, H, W)

    out = jax.block_until_ready(forward(x, prep))
    assert out.shape == (N, C, H, W), out.shape

    ref = jax.block_until_ready(ref_forward(x, params))
    max_err = float(jnp.max(jnp.abs(out - ref)))
    mean_err = float(jnp.mean(jnp.abs(out - ref)))
    # bf16 MXU operands + bf16 stored intermediates (f32 accumulate / f32 BN
    # math) -> bf16-level tolerance; still far below the O(1) error any
    # column-ordering / transpose bug would produce.
    assert max_err < 1e-1 and mean_err < 2.5e-2, (max_err, mean_err)

    print("KERNEL_OK")
</pallas_src>

<mosaic_0001>
module attributes {stable_mosaic.version = 11 : i64} {
  func.func @_stage_kernel(%arg0: i32, %arg1: memref<16x128xbf16, #tpu.memory_space<vmem>>, %arg2: memref<128x512xbf16, #tpu.memory_space<vmem>>, %arg3: memref<1x512xf32, #tpu.memory_space<vmem>>, %arg4: memref<16x512xbf16, #tpu.memory_space<vmem>>) attributes {dimension_semantics = [#tpu.dimension_semantics<parallel>], iteration_bounds = array<i64: 1>, scalar_prefetch = 0 : i64, scratch_operands = 0 : i64, tpu.core_type = #tpu.core_type<tc>, window_params = [{transform_indices = @transform_0, window_bounds = array<i64: 16, 128>}, {pipeline_mode = #tpu.pipeline_mode<synchronous>, transform_indices = @transform_1, window_bounds = array<i64: 128, 512>}, {pipeline_mode = #tpu.pipeline_mode<synchronous>, transform_indices = @transform_2, window_bounds = array<i64: 1, 512>}, {transform_indices = @transform_3, window_bounds = array<i64: 16, 512>}]} {
    %c0 = arith.constant 0 : index
    %c0_0 = arith.constant 0 : index
    %0 = vector.load %arg1[%c0, %c0_0] : memref<16x128xbf16, #tpu.memory_space<vmem>>, vector<16x128xbf16>
    %c0_1 = arith.constant 0 : index
    %c0_2 = arith.constant 0 : index
    %1 = vector.load %arg2[%c0_1, %c0_2] : memref<128x512xbf16, #tpu.memory_space<vmem>>, vector<128x512xbf16>
    %cst = arith.constant dense<0.000000e+00> : vector<16x512xf32>
    %2 = tpu.matmul %0, %1, %cst {dimension_numbers = #tpu.dot_dimension_numbers<[1], [0], [0], [1], [0, 0, 1, 1], [], []>} : vector<16x128xbf16>, vector<128x512xbf16>, vector<16x512xf32> -> vector<16x512xf32>
    %c0_3 = arith.constant 0 : index
    %c0_4 = arith.constant 0 : index
    %3 = vector.load %arg3[%c0_3, %c0_4] : memref<1x512xf32, #tpu.memory_space<vmem>>, vector<1x512xf32>
    %4 = vector.broadcast %3 : vector<1x512xf32> to vector<16x512xf32>
    %5 = arith.addf %2, %4 : vector<16x512xf32>
    %cst_5 = arith.constant 2.000000e-01 : f32
    %6 = vector.broadcast %cst_5 : f32 to vector<16x512xf32>
    %7 = arith.mulf %6, %5 : vector<16x512xf32>
    %8 = arith.maximumf %5, %7 : vector<16x512xf32>
    %9 = arith.truncf %8 : vector<16x512xf32> to vector<16x512xbf16>
    %c0_6 = arith.constant 0 : index
    %c0_7 = arith.constant 0 : index
    %10 = vector.load %arg4[%c0_6, %c0_7] : memref<16x512xbf16, #tpu.memory_space<vmem>>, vector<16x512xbf16>
    tpu.vector_store %arg4[%c0_6, %c0_7], %9 {strides = array<i32>} : memref<16x512xbf16, #tpu.memory_space<vmem>>, vector<16x512xbf16>,
    return
  }
  func.func @transform_0(%arg0: i32) -> (i32, i32) {
    %c0_i32 = arith.constant 0 : i32
    %c0_i32_0 = arith.constant 0 : i32
    return %arg0, %c0_i32 : i32, i32
  }
  func.func @transform_1(%arg0: i32) -> (i32, i32) {
    %c0_i32 = arith.constant 0 : i32
    %c0_i32_0 = arith.constant 0 : i32
    %c0_i32_1 = arith.constant 0 : i32
    return %c0_i32, %c0_i32_0 : i32, i32
  }
  func.func @transform_2(%arg0: i32) -> (i32, i32) {
    %c0_i32 = arith.constant 0 : i32
    %c0_i32_0 = arith.constant 0 : i32
    %c0_i32_1 = arith.constant 0 : i32
    return %c0_i32, %c0_i32_0 : i32, i32
  }
  func.func @transform_3(%arg0: i32) -> (i32, i32) {
    %c0_i32 = arith.constant 0 : i32
    %c0_i32_0 = arith.constant 0 : i32
    return %arg0, %c0_i32 : i32, i32
  }
}

module attributes {stable_mosaic.version = 11 : i64} {
  func.func @_stage_kernel(%arg0: i32, %arg1: memref<16x512xbf16, #tpu.memory_space<vmem>>, %arg2: memref<512x256xbf16, #tpu.memory_space<vmem>>, %arg3: memref<1x256xf32, #tpu.memory_space<vmem>>, %arg4: memref<16x256xbf16, #tpu.memory_space<vmem>>, %arg5: memref<1x2x256xf32, #tpu.memory_space<vmem>>) attributes {dimension_semantics = [#tpu.dimension_semantics<parallel>], iteration_bounds = array<i64: 1>, scalar_prefetch = 0 : i64, scratch_operands = 0 : i64, tpu.core_type = #tpu.core_type<tc>, window_params = [{transform_indices = @transform_0, window_bounds = array<i64: 16, 512>}, {pipeline_mode = #tpu.pipeline_mode<synchronous>, transform_indices = @transform_1, window_bounds = array<i64: 512, 256>}, {pipeline_mode = #tpu.pipeline_mode<synchronous>, transform_indices = @transform_2, window_bounds = array<i64: 1, 256>}, {transform_indices = @transform_3, window_bounds = array<i64: 16, 256>}, {transform_indices = @transform_4, window_bounds = array<i64: 1, 2, 256>}]} {
    %c0 = arith.constant 0 : index
    %c0_0 = arith.constant 0 : index
    %0 = vector.load %arg1[%c0, %c0_0] : memref<16x512xbf16, #tpu.memory_space<vmem>>, vector<16x512xbf16>
    %c0_1 = arith.constant 0 : index
    %c0_2 = arith.constant 0 : index
    %1 = vector.load %arg2[%c0_1, %c0_2] : memref<512x256xbf16, #tpu.memory_space<vmem>>, vector<512x256xbf16>
    %cst = arith.constant dense<0.000000e+00> : vector<16x256xf32>
    %2 = tpu.matmul %0, %1, %cst {dimension_numbers = #tpu.dot_dimension_numbers<[1], [0], [0], [1], [0, 0, 1, 1], [], []>} : vector<16x512xbf16>, vector<512x256xbf16>, vector<16x256xf32> -> vector<16x256xf32>
    %c0_3 = arith.constant 0 : index
    %c0_4 = arith.constant 0 : index
    %3 = vector.load %arg3[%c0_3, %c0_4] : memref<1x256xf32, #tpu.memory_space<vmem>>, vector<1x256xf32>
    %4 = vector.broadcast %3 : vector<1x256xf32> to vector<16x256xf32>
    %5 = arith.addf %2, %4 : vector<16x256xf32>
    %6 = arith.truncf %5 : vector<16x256xf32> to vector<16x256xbf16>
    %c0_5 = arith.constant 0 : index
    %c0_6 = arith.constant 0 : index
    %7 = vector.load %arg4[%c0_5, %c0_6] : memref<16x256xbf16, #tpu.memory_space<vmem>>, vector<16x256xbf16>
    tpu.vector_store %arg4[%c0_5, %c0_6], %6 {strides = array<i32>} : memref<16x256xbf16, #tpu.memory_space<vmem>>, vector<16x256xbf16>,
    %cst_7 = arith.constant dense<0.000000e+00> : vector<256xf32>
    %8 = vector.multi_reduction <add>, %5, %cst_7 [0] : vector<16x256xf32> to vector<256xf32>
    %9 = vector.shape_cast %8 : vector<256xf32> to vector<1x256xf32>
    %10 = arith.mulf %5, %5 : vector<16x256xf32>
    %cst_8 = arith.constant dense<0.000000e+00> : vector<256xf32>
    %11 = vector.multi_reduction <add>, %10, %cst_8 [0] : vector<16x256xf32> to vector<256xf32>
    %12 = vector.shape_cast %11 : vector<256xf32> to vector<1x256xf32>
    %13 = tpu.concatenate %9, %12 in 0 : vector<1x256xf32>, vector<1x256xf32> -> vector<2x256xf32>
    %c0_9 = arith.constant 0 : index
    %c0_10 = arith.constant 0 : index
    %c0_11 = arith.constant 0 : index
    %14 = vector.load %arg5[%c0_9, %c0_10, %c0_11] : memref<1x2x256xf32, #tpu.memory_space<vmem>>, vector<1x2x256xf32>
    %15 = vector.shape_cast %14 : vector<1x2x256xf32> to vector<2x256xf32>
    %16 = vector.shape_cast %13 : vector<2x256xf32> to vector<1x2x256xf32>
    tpu.vector_store %arg5[%c0_9, %c0_10, %c0_11], %16 {strides = array<i32>} : memref<1x2x256xf32, #tpu.memory_space<vmem>>, vector<1x2x256xf32>,
    return
  }
  func.func @transform_0(%arg0: i32) -> (i32, i32) {
    %c0_i32 = arith.constant 0 : i32
    %c0_i32_0 = arith.constant 0 : i32
    return %arg0, %c0_i32 : i32, i32
  }
  func.func @transform_1(%arg0: i32) -> (i32, i32) {
    %c0_i32 = arith.constant 0 : i32
    %c0_i32_0 = arith.constant 0 : i32
    %c0_i32_1 = arith.constant 0 : i32
    return %c0_i32, %c0_i32_0 : i32, i32
  }
  func.func @transform_2(%arg0: i32) -> (i32, i32) {
    %c0_i32 = arith.constant 0 : i32
    %c0_i32_0 = arith.constant 0 : i32
    %c0_i32_1 = arith.constant 0 : i32
    return %c0_i32, %c0_i32_0 : i32, i32
  }
  func.func @transform_3(%arg0: i32) -> (i32, i32) {
    %c0_i32 = arith.constant 0 : i32
    %c0_i32_0 = arith.constant 0 : i32
    return %arg0, %c0_i32 : i32, i32
  }
  func.func @transform_4(%arg0: i32) -> (i32, i32, i32) {
    %c0_i32 = arith.constant 0 : i32
    %c0_i32_0 = arith.constant 0 : i32
    %c0_i32_1 = arith.constant 0 : i32
    return %arg0, %c0_i32, %c0_i32_0 : i32, i32, i32
  }
}

module attributes {stable_mosaic.version = 11 : i64} {
  func.func @_stage_kernel(%arg0: i32, %arg1: memref<32x128xbf16, #tpu.memory_space<vmem>>, %arg2: memref<1x128xf32, #tpu.memory_space<vmem>>, %arg3: memref<1x128xf32, #tpu.memory_space<vmem>>, %arg4: memref<128x256xbf16, #tpu.memory_space<vmem>>, %arg5: memref<1x256xf32, #tpu.memory_space<vmem>>, %arg6: memref<32x256xbf16, #tpu.memory_space<vmem>>, %arg7: memref<1x2x256xf32, #tpu.memory_space<vmem>>) attributes {dimension_semantics = [#tpu.dimension_semantics<parallel>], iteration_bounds = array<i64: 1>, scalar_prefetch = 0 : i64, scratch_operands = 0 : i64, tpu.core_type = #tpu.core_type<tc>, window_params = [{transform_indices = @transform_0, window_bounds = array<i64: 32, 128>}, {pipeline_mode = #tpu.pipeline_mode<synchronous>, transform_indices = @transform_1, window_bounds = array<i64: 1, 128>}, {pipeline_mode = #tpu.pipeline_mode<synchronous>, transform_indices = @transform_2, window_bounds = array<i64: 1, 128>}, {pipeline_mode = #tpu.pipeline_mode<synchronous>, transform_indices = @transform_3, window_bounds = array<i64: 128, 256>}, {pipeline_mode = #tpu.pipeline_mode<synchronous>, transform_indices = @transform_4, window_bounds = array<i64: 1, 256>}, {transform_indices = @transform_5, window_bounds = array<i64: 32, 256>}, {transform_indices = @transform_6, window_bounds = array<i64: 1, 2, 256>}]} {
    %c0 = arith.constant 0 : index
    %c0_0 = arith.constant 0 : index
    %0 = vector.load %arg1[%c0, %c0_0] : memref<32x128xbf16, #tpu.memory_space<vmem>>, vector<32x128xbf16>
    %1 = arith.extf %0 : vector<32x128xbf16> to vector<32x128xf32>
    %c0_1 = arith.constant 0 : index
    %c0_2 = arith.constant 0 : index
    %2 = vector.load %arg2[%c0_1, %c0_2] : memref<1x128xf32, #tpu.memory_space<vmem>>, vector<1x128xf32>
    %3 = vector.broadcast %2 : vector<1x128xf32> to vector<32x128xf32>
    %4 = arith.mulf %1, %3 : vector<32x128xf32>
    %c0_3 = arith.constant 0 : index
    %c0_4 = arith.constant 0 : index
    %5 = vector.load %arg3[%c0_3, %c0_4] : memref<1x128xf32, #tpu.memory_space<vmem>>, vector<1x128xf32>
    %6 = vector.broadcast %5 : vector<1x128xf32> to vector<32x128xf32>
    %7 = arith.addf %4, %6 : vector<32x128xf32>
    %cst = arith.constant 2.000000e-01 : f32
    %8 = vector.broadcast %cst : f32 to vector<32x128xf32>
    %9 = arith.mulf %8, %7 : vector<32x128xf32>
    %10 = arith.maximumf %7, %9 : vector<32x128xf32>
    %11 = arith.truncf %10 : vector<32x128xf32> to vector<32x128xbf16>
    %c0_5 = arith.constant 0 : index
    %c0_6 = arith.constant 0 : index
    %12 = vector.load %arg4[%c0_5, %c0_6] : memref<128x256xbf16, #tpu.memory_space<vmem>>, vector<128x256xbf16>
    %cst_7 = arith.constant dense<0.000000e+00> : vector<32x256xf32>
    %13 = tpu.matmul %11, %12, %cst_7 {dimension_numbers = #tpu.dot_dimension_numbers<[1], [0], [0], [1], [0, 0, 1, 1], [], []>} : vector<32x128xbf16>, vector<128x256xbf16>, vector<32x256xf32> -> vector<32x256xf32>
    %c0_8 = arith.constant 0 : index
    %c0_9 = arith.constant 0 : index
    %14 = vector.load %arg5[%c0_8, %c0_9] : memref<1x256xf32, #tpu.memory_space<vmem>>, vector<1x256xf32>
    %15 = vector.broadcast %14 : vector<1x256xf32> to vector<32x256xf32>
    %16 = arith.addf %13, %15 : vector<32x256xf32>
    %17 = arith.truncf %16 : vector<32x256xf32> to vector<32x256xbf16>
    %c0_10 = arith.constant 0 : index
    %c0_11 = arith.constant 0 : index
    %18 = vector.load %arg6[%c0_10, %c0_11] : memref<32x256xbf16, #tpu.memory_space<vmem>>, vector<32x256xbf16>
    tpu.vector_store %arg6[%c0_10, %c0_11], %17 {strides = array<i32>} : memref<32x256xbf16, #tpu.memory_space<vmem>>, vector<32x256xbf16>,
    %cst_12 = arith.constant dense<0.000000e+00> : vector<256xf32>
    %19 = vector.multi_reduction <add>, %16, %cst_12 [0] : vector<32x256xf32> to vector<256xf32>
    %20 = vector.shape_cast %19 : vector<256xf32> to vector<1x256xf32>
    %21 = arith.mulf %16, %16 : vector<32x256xf32>
    %cst_13 = arith.constant dense<0.000000e+00> : vector<256xf32>
    %22 = vector.multi_reduction <add>, %21, %cst_13 [0] : vector<32x256xf32> to vector<256xf32>
    %23 = vector.shape_cast %22 : vector<256xf32> to vector<1x256xf32>
    %24 = tpu.concatenate %20, %23 in 0 : vector<1x256xf32>, vector<1x256xf32> -> vector<2x256xf32>
    %c0_14 = arith.constant 0 : index
    %c0_15 = arith.constant 0 : index
    %c0_16 = arith.constant 0 : index
    %25 = vector.load %arg7[%c0_14, %c0_15, %c0_16] : memref<1x2x256xf32, #tpu.memory_space<vmem>>, vector<1x2x256xf32>
    %26 = vector.shape_cast %25 : vector<1x2x256xf32> to vector<2x256xf32>
    %27 = vector.shape_cast %24 : vector<2x256xf32> to vector<1x2x256xf32>
    tpu.vector_store %arg7[%c0_14, %c0_15, %c0_16], %27 {strides = array<i32>} : memref<1x2x256xf32, #tpu.memory_space<vmem>>, vector<1x2x256xf32>,
    return
  }
  func.func @transform_0(%arg0: i32) -> (i32, i32) {
    %c0_i32 = arith.constant 0 : i32
    %c0_i32_0 = arith.constant 0 : i32
    return %arg0, %c0_i32 : i32, i32
  }
  func.func @transform_1(%arg0: i32) -> (i32, i32) {
    %c0_i32 = arith.constant 0 : i32
    %c0_i32_0 = arith.constant 0 : i32
    %c0_i32_1 = arith.constant 0 : i32
    return %c0_i32, %c0_i32_0 : i32, i32
  }
  func.func @transform_2(%arg0: i32) -> (i32, i32) {
    %c0_i32 = arith.constant 0 : i32
    %c0_i32_0 = arith.constant 0 : i32
    %c0_i32_1 = arith.constant 0 : i32
    return %c0_i32, %c0_i32_0 : i32, i32
  }
  func.func @transform_3(%arg0: i32) -> (i32, i32) {
    %c0_i32 = arith.constant 0 : i32
    %c0_i32_0 = arith.constant 0 : i32
    %c0_i32_1 = arith.constant 0 : i32
    return %c0_i32, %c0_i32_0 : i32, i32
  }
  func.func @transform_4(%arg0: i32) -> (i32, i32) {
    %c0_i32 = arith.constant 0 : i32
    %c0_i32_0 = arith.constant 0 : i32
    %c0_i32_1 = arith.constant 0 : i32
    return %c0_i32, %c0_i32_0 : i32, i32
  }
  func.func @transform_5(%arg0: i32) -> (i32, i32) {
    %c0_i32 = arith.constant 0 : i32
    %c0_i32_0 = arith.constant 0 : i32
    return %arg0, %c0_i32 : i32, i32
  }
  func.func @transform_6(%arg0: i32) -> (i32, i32, i32) {
    %c0_i32 = arith.constant 0 : i32
    %c0_i32_0 = arith.constant 0 : i32
    %c0_i32_1 = arith.constant 0 : i32
    return %arg0, %c0_i32, %c0_i32_0 : i32, i32, i32
  }
}

module attributes {stable_mosaic.version = 11 : i64} {
  func.func @_stage_kernel(%arg0: i32, %arg1: memref<8x1024xbf16, #tpu.memory_space<vmem>>, %arg2: memref<1x1024xf32, #tpu.memory_space<vmem>>, %arg3: memref<1x1024xf32, #tpu.memory_space<vmem>>, %arg4: memref<1024x256xbf16, #tpu.memory_space<vmem>>, %arg5: memref<1x256xf32, #tpu.memory_space<vmem>>, %arg6: memref<8x256xf32, #tpu.memory_space<vmem>>) attributes {dimension_semantics = [#tpu.dimension_semantics<parallel>], iteration_bounds = array<i64: 1>, scalar_prefetch = 0 : i64, scratch_operands = 0 : i64, tpu.core_type = #tpu.core_type<tc>, window_params = [{transform_indices = @transform_0, window_bounds = array<i64: 8, 1024>}, {pipeline_mode = #tpu.pipeline_mode<synchronous>, transform_indices = @transform_1, window_bounds = array<i64: 1, 1024>}, {pipeline_mode = #tpu.pipeline_mode<synchronous>, transform_indices = @transform_2, window_bounds = array<i64: 1, 1024>}, {pipeline_mode = #tpu.pipeline_mode<synchronous>, transform_indices = @transform_3, window_bounds = array<i64: 1024, 256>}, {pipeline_mode = #tpu.pipeline_mode<synchronous>, transform_indices = @transform_4, window_bounds = array<i64: 1, 256>}, {transform_indices = @transform_5, window_bounds = array<i64: 8, 256>}]} {
    %c0 = arith.constant 0 : index
    %c0_0 = arith.constant 0 : index
    %0 = vector.load %arg1[%c0, %c0_0] : memref<8x1024xbf16, #tpu.memory_space<vmem>>, vector<8x1024xbf16>
    %1 = arith.extf %0 : vector<8x1024xbf16> to vector<8x1024xf32>
    %c0_1 = arith.constant 0 : index
    %c0_2 = arith.constant 0 : index
    %2 = vector.load %arg2[%c0_1, %c0_2] : memref<1x1024xf32, #tpu.memory_space<vmem>>, vector<1x1024xf32>
    %3 = vector.broadcast %2 : vector<1x1024xf32> to vector<8x1024xf32>
    %4 = arith.mulf %1, %3 : vector<8x1024xf32>
    %c0_3 = arith.constant 0 : index
    %c0_4 = arith.constant 0 : index
    %5 = vector.load %arg3[%c0_3, %c0_4] : memref<1x1024xf32, #tpu.memory_space<vmem>>, vector<1x1024xf32>
    %6 = vector.broadcast %5 : vector<1x1024xf32> to vector<8x1024xf32>
    %7 = arith.addf %4, %6 : vector<8x1024xf32>
    %cst = arith.constant 2.000000e-01 : f32
    %8 = vector.broadcast %cst : f32 to vector<8x1024xf32>
    %9 = arith.mulf %8, %7 : vector<8x1024xf32>
    %10 = arith.maximumf %7, %9 : vector<8x1024xf32>
    %11 = arith.truncf %10 : vector<8x1024xf32> to vector<8x1024xbf16>
    %c0_5 = arith.constant 0 : index
    %c0_6 = arith.constant 0 : index
    %12 = vector.load %arg4[%c0_5, %c0_6] : memref<1024x256xbf16, #tpu.memory_space<vmem>>, vector<1024x256xbf16>
    %cst_7 = arith.constant dense<0.000000e+00> : vector<8x256xf32>
    %13 = tpu.matmul %11, %12, %cst_7 {dimension_numbers = #tpu.dot_dimension_numbers<[1], [0], [0], [1], [0, 0, 1, 1], [], []>} : vector<8x1024xbf16>, vector<1024x256xbf16>, vector<8x256xf32> -> vector<8x256xf32>
    %c0_8 = arith.constant 0 : index
    %c0_9 = arith.constant 0 : index
    %14 = vector.load %arg5[%c0_8, %c0_9] : memref<1x256xf32, #tpu.memory_space<vmem>>, vector<1x256xf32>
    %15 = vector.broadcast %14 : vector<1x256xf32> to vector<8x256xf32>
    %16 = arith.addf %13, %15 : vector<8x256xf32>
    %17 = math.tanh %16 : vector<8x256xf32>
    %c0_10 = arith.constant 0 : index
    %c0_11 = arith.constant 0 : index
    %18 = vector.load %arg6[%c0_10, %c0_11] : memref<8x256xf32, #tpu.memory_space<vmem>>, vector<8x256xf32>
    tpu.vector_store %arg6[%c0_10, %c0_11], %17 {strides = array<i32>} : memref<8x256xf32, #tpu.memory_space<vmem>>, vector<8x256xf32>,
    return
  }
  func.func @transform_0(%arg0: i32) -> (i32, i32) {
    %c0_i32 = arith.constant 0 : i32
    %c0_i32_0 = arith.constant 0 : i32
    return %arg0, %c0_i32 : i32, i32
  }
  func.func @transform_1(%arg0: i32) -> (i32, i32) {
    %c0_i32 = arith.constant 0 : i32
    %c0_i32_0 = arith.constant 0 : i32
    %c0_i32_1 = arith.constant 0 : i32
    return %c0_i32, %c0_i32_0 : i32, i32
  }
  func.func @transform_2(%arg0: i32) -> (i32, i32) {
    %c0_i32 = arith.constant 0 : i32
    %c0_i32_0 = arith.constant 0 : i32
    %c0_i32_1 = arith.constant 0 : i32
    return %c0_i32, %c0_i32_0 : i32, i32
  }
  func.func @transform_3(%arg0: i32) -> (i32, i32) {
    %c0_i32 = arith.constant 0 : i32
    %c0_i32_0 = arith.constant 0 : i32
    %c0_i32_1 = arith.constant 0 : i32
    return %c0_i32, %c0_i32_0 : i32, i32
  }
  func.func @transform_4(%arg0: i32) -> (i32, i32) {
    %c0_i32 = arith.constant 0 : i32
    %c0_i32_0 = arith.constant 0 : i32
    %c0_i32_1 = arith.constant 0 : i32
    return %c0_i32, %c0_i32_0 : i32, i32
  }
  func.func @transform_5(%arg0: i32) -> (i32, i32) {
    %c0_i32 = arith.constant 0 : i32
    %c0_i32_0 = arith.constant 0 : i32
    return %arg0, %c0_i32 : i32, i32
  }
}

</mosaic_0001>

<bundles_post_ra>
// kernel: forward.4
= control target key start
LH: loop header
LB: loop body
LE: loop exit
PB: predicated region body
PF: predicated region fallthrough
CT: control target
= control target key end

     0   :  { %v462_v1 = vmov 0   ;;  %v51_v34 = vlaneseq  ;;  %s597_s1 = inlined_call_operand.vmem [shape: bf16[128,512], index: 1, kind: input, shape index: {}]   ;;  %s598_s0 = inlined_call_operand.vmem [shape: bf16[16,128], index: 0, kind: input, shape index: {}]   ;;  %s599_s2 = inlined_call_operand.vmem [shape: f32[1,512], index: 2, kind: input, shape index: {}]   ;;  %s600_s3 = inlined_call_operand.vmem [shape: bf16[16,512], index: 3, kind: output, shape index: {}]  }
   0x1   :  { %v413_v0 = vld [vmem:[%s597_s1 + $0xe4] ss:$16 sps:$4 sm:$0xff]   ;;  %269 = vmatprep.mubr.bf16.mxu0 %v462_v1  ;;  %312 = vmatprep.mubr.bf16.mxu1 %v462_v1  ;;  %v415_v2 = vld [vmem:[%s597_s1 + $0xec] ss:$16 sps:$4 sm:$0xff]   ;;  %v417_v3 = vld [vmem:[%s597_s1 + $0xe0] ss:$16 sps:$4 sm:$0xff]  }
   0x2   :  { %237 = vmatprep.subr.bf16.mxu0 %v413_v0  ;;  %v418_v4 = vld [vmem:[%s597_s1 + $0xe8] ss:$16 sps:$4 sm:$0xff]   ;;  %280 = vmatprep.subr.bf16.mxu1 %v415_v2  ;;  %v419_v5 = vld [vmem:[%s597_s1 + $0xc4] ss:$16 sps:$4 sm:$0xff]   ;;  %v421_v6 = vld [vmem:[%s597_s1 + $0xcc] ss:$16 sps:$4 sm:$0xff]  }
   0x3   :  { %238 = vmatpush1.bf16.msra.mxu0 %v417_v3  ;;  %281 = vmatpush1.bf16.msra.mxu1 %v418_v4  ;;  %v423_v7 = vld [vmem:[%s597_s1 + $0xc0] ss:$16 sps:$4 sm:$0xff]   ;;  %v424_v8 = vld [vmem:[%s597_s1 + $0xc8] ss:$16 sps:$4 sm:$0xff]   ;;  %v425_v9 = vld [vmem:[%s597_s1 + $0xa4] ss:$16 sps:$4 sm:$0xff]  }
   0x4   :  { %239 = vmatprep.subr.bf16.mxu0 %v419_v5  ;;  %282 = vmatprep.subr.bf16.mxu1 %v421_v6  ;;  %v427_v10 = vld [vmem:[%s597_s1 + $0xac] ss:$16 sps:$4 sm:$0xff]   ;;  %v429_v11 = vld [vmem:[%s597_s1 + $0xa0] ss:$16 sps:$4 sm:$0xff]   ;;  %v430_v12 = vld [vmem:[%s597_s1 + $0xa8] ss:$16 sps:$4 sm:$0xff]  }
   0x5   :  { %v431_v13 = vld [vmem:[%s597_s1 + $0x84] ss:$16 sps:$4 sm:$0xff]   ;;  %v433_v14 = vld [vmem:[%s597_s1 + $0x8c] ss:$16 sps:$4 sm:$0xff]   ;;  %v435_v15 = vld [vmem:[%s597_s1 + $0x80] ss:$16 sps:$4 sm:$0xff]  }
   0x6   :  { %v436_v16 = vld [vmem:[%s597_s1 + $0x88] ss:$16 sps:$4 sm:$0xff]   ;;  %v437_v17 = vld [vmem:[%s597_s1 + $0x64] ss:$16 sps:$4 sm:$0xff]   ;;  %v439_v18 = vld [vmem:[%s597_s1 + $0x6c] ss:$16 sps:$4 sm:$0xff]  }
   0x7   :  { %240 = vmatpush1.bf16.msra.mxu0 %v423_v7  ;;  %283 = vmatpush1.bf16.msra.mxu1 %v424_v8  ;;  %v441_v19 = vld [vmem:[%s597_s1 + $0x60] ss:$16 sps:$4 sm:$0xff]   ;;  %v442_v20 = vld [vmem:[%s597_s1 + $0x68] ss:$16 sps:$4 sm:$0xff]   ;;  %v443_v21 = vld [vmem:[%s597_s1 + $0x44] ss:$16 sps:$4 sm:$0xff]  }
   0x8   :  { %241 = vmatprep.subr.bf16.mxu0 %v425_v9  ;;  %284 = vmatprep.subr.bf16.mxu1 %v427_v10  ;;  %v445_v22 = vld [vmem:[%s597_s1 + $0x4c] ss:$16 sps:$4 sm:$0xff]   ;;  %v447_v23 = vld [vmem:[%s597_s1 + $0x40] ss:$16 sps:$4 sm:$0xff]   ;;  %v448_v24 = vld [vmem:[%s597_s1 + $0x48] ss:$16 sps:$4 sm:$0xff]  }
   0x9   :  { %v449_v25 = vld [vmem:[%s597_s1 + $0x24] ss:$16 sps:$4 sm:$0xff]   ;;  %v451_v26 = vld [vmem:[%s597_s1 + $0x2c] ss:$16 sps:$4 sm:$0xff]   ;;  %v453_v27 = vld [vmem:[%s597_s1 + $0x20] ss:$16 sps:$4 sm:$0xff]  }
   0xa   :  { %v454_v28 = vld [vmem:[%s597_s1 + $0x28] ss:$16 sps:$4 sm:$0xff]   ;;  %v455_v29 = vld [vmem:[%s597_s1 + $0x4] ss:$16 sps:$4 sm:$0xff]   ;;  %v457_v30 = vld [vmem:[%s597_s1 + $0xc] ss:$16 sps:$4 sm:$0xff]  }
   0xb   :  { %242 = vmatpush1.bf16.msra.mxu0 %v429_v11  ;;  %285 = vmatpush1.bf16.msra.mxu1 %v430_v12  ;;  %v459_v31 = vld [vmem:[%s597_s1] ss:$16 sps:$4 sm:$0xff]   ;;  %v460_v32 = vld [vmem:[%s597_s1 + $0x8] ss:$16 sps:$4 sm:$0xff]   ;;  %v52_v35 = vshrl.u32 %v51_v34, 7 }
   0xc   :  { %243 = vmatprep.subr.bf16.mxu0 %v431_v13  ;;  %286 = vmatprep.subr.bf16.mxu1 %v433_v14  ;;  %v461_v33 = vld [vmem:[%s598_s0] sm:$0xff]  }
   0xd   :  { %v53_v36 = vsub.s32 0, %v52_v35  ;;  %v61_v37 = vsub.s32 2, %v52_v35  ;;  %v49_v38 = vld [vmem:[%s599_s2] sm:$0xf]  ;;  %v57_v39 = vsub.s32 1, %v52_v35  ;;  %v65_v40 = vsub.s32 3, %v52_v35 }
   0xf   :  { %244 = vmatpush1.bf16.msra.mxu0 %v435_v15  ;;  %287 = vmatpush1.bf16.msra.mxu1 %v436_v16  ;;  %v54_v41 = vrot.slane %v49_v38, %v53_v36  ;;  %v62_v42 = vrot.slane %v49_v38, %v61_v37  ;;  %v58_v43 = vrot.slane %v49_v38, %v57_v39 }
  0x10   :  { %245 = vmatprep.subr.bf16.mxu0 %v437_v17  ;;  %288 = vmatprep.subr.bf16.mxu1 %v439_v18  ;;  %v66_v44 = vrot.slane %v49_v38, %v65_v40 }
  0x13   :  { %246 = vmatpush1.bf16.msra.mxu0 %v441_v19  ;;  %289 = vmatpush1.bf16.msra.mxu1 %v442_v20 }
  0x14   :  { %247 = vmatprep.subr.bf16.mxu0 %v443_v21  ;;  %290 = vmatprep.subr.bf16.mxu1 %v445_v22 }
  0x17   :  { %248 = vmatpush1.bf16.msra.mxu0 %v447_v23  ;;  %291 = vmatpush1.bf16.msra.mxu1 %v448_v24 }
  0x18   :  { %249 = vmatprep.subr.bf16.mxu0 %v449_v25  ;;  %292 = vmatprep.subr.bf16.mxu1 %v451_v26 }
  0x1b   :  { %250 = vmatpush1.bf16.msra.mxu0 %v453_v27  ;;  %293 = vmatpush1.bf16.msra.mxu1 %v454_v28 }
  0x1c   :  { %251 = vmatprep.subr.bf16.mxu0 %v455_v29  ;;  %294 = vmatprep.subr.bf16.mxu1 %v457_v30 }
  0x1f   :  { %252 = vmatpush1.bf16.msra.mxu0 %v459_v31  ;;  %295 = vmatpush1.bf16.msra.mxu1 %v460_v32 }
  0x22   :  { %270 = vmatmul.mubr.bf16.vlgmr.msra.gmra.mxu0 %v461_v33  ;;  %313 = vmatmul.mubr.bf16.vlgmr.msra.gmra.mxu1 %v461_v33 }
  0xe2   :  { %v271_v45 = vpop.f32.mrf.mxu0  ;;  %v314_v46 = vpop.f32.mrf.mxu1 }
  0xe3   :  { %v272_v47 = vadd.f32 %v271_v45, %v54_v41  ;;  %v315_v48 = vadd.f32 %v314_v46, %v62_v42 }
  0xe4   :  { %v273_v49 = vpop.f32.mrf.mxu0  ;;  %v316_v50 = vpop.f32.mrf.mxu1 }
  0xe5   :  { %v323_v51 = vmul.f32 0.2, %v272_v47  ;;  %v325_v52 = vmul.f32 0.2, %v315_v48  ;;  %v274_v53 = vadd.f32 %v273_v49, %v58_v43  ;;  %v317_v54 = vadd.f32 %v316_v50, %v66_v44 }
  0xe6   :  { %v275_v55 = vpop.f32.mrf.mxu0  ;;  %v318_v56 = vpop.f32.mrf.mxu1 }
  0xe7   :  { %v324_v57 = vmul.f32 0.2, %v274_v53  ;;  %v326_v58 = vmul.f32 0.2, %v317_v54  ;;  %v331_v59 = vmax.f32 %v272_v47, %v323_v51  ;;  %v333_v60 = vmax.f32 %v315_v48, %v325_v52 }
  0xe8   :  { %v276_v61 = vadd.f32 %v275_v55, %v54_v41  ;;  %v319_v62 = vadd.f32 %v318_v56, %v62_v42  ;;  %v277_v63 = vpop.f32.mrf.mxu0  ;;  %v320_v0 = vpop.f32.mrf.mxu1 }
  0xe9   :  { %v332_v1 = vmax.f32 %v274_v53, %v324_v57  ;;  %v334_v2 = vmax.f32 %v317_v54, %v326_v58  ;;  %v278_v3 = vadd.f32 %v277_v63, %v58_v43  ;;  %v321_v4 = vadd.f32 %v320_v0, %v66_v44 }
  0xea   :  { %v327_v5 = vmul.f32 0.2, %v276_v61  ;;  %v329_v6 = vmul.f32 0.2, %v319_v62 }
  0xeb   :  { %v408_v7 = vpack.c.bf16 %v332_v1, %v331_v59  ;;  %v409_v8 = vpack.c.bf16 %v334_v2, %v333_v60  ;;  %v328_v9 = vmul.f32 0.2, %v278_v3  ;;  %v330_v10 = vmul.f32 0.2, %v321_v4 }
  0xec   :  { %v335_v11 = vmax.f32 %v276_v61, %v327_v5  ;;  %v337_v12 = vmax.f32 %v319_v62, %v329_v6 }
  0xed   :  { %363 = vst [vmem:[%s600_s3] sm:$0xff] %v408_v7  ;;  %364 = vst [vmem:[%s600_s3 + $0x8] sm:$0xff] %v409_v8  ;;  %v336_v13 = vmax.f32 %v278_v3, %v328_v9  ;;  %v338_v14 = vmax.f32 %v321_v4, %v330_v10 }
  0xef   :  { %v410_v15 = vpack.c.bf16 %v336_v13, %v335_v11  ;;  %v411_v16 = vpack.c.bf16 %v338_v14, %v337_v12 }
  0xf1   :  { %365 = vst [vmem:[%s600_s3 + $0x10] sm:$0xff] %v410_v15  ;;  %366 = vst [vmem:[%s600_s3 + $0x18] sm:$0xff] %v411_v16 }

// kernel: forward.5
= control target key start
LH: loop header
LB: loop body
LE: loop exit
PB: predicated region body
PF: predicated region fallthrough
CT: control target
= control target key end

     0   :  { %vm568_vm0 = vcmask 1040384   ;;  %s1007_s1 = inlined_call_operand.vmem [shape: bf16[512,256], index: 1, kind: input, shape index: {}]   ;;  %s1008_s0 = inlined_call_operand.vmem [shape: bf16[16,512], index: 0, kind: input, shape index: {}]   ;;  %s1009_s2 = inlined_call_operand.vmem [shape: f32[1,256], index: 2, kind: input, shape index: {}]   ;;  %s1010_s3 = inlined_call_operand.vmem [shape: bf16[16,256], index: 3, kind: output, shape index: {0}]   ;;  %s1011_s4 = inlined_call_operand.vmem [shape: f32[1,2,256], index: 4, kind: output, shape index: {1}]  }
   0x1   :  { %v664_v0 = vld [vmem:[%s1007_s1 + $0x74] ss:$8 sps:$4 sm:$0xff]   ;;  %v668_v2 = vld [vmem:[%s1007_s1 + $0x70] ss:$8 sps:$4 sm:$0xff]   ;;  %v670_v4 = vld [vmem:[%s1007_s1 + $0x64] ss:$8 sps:$4 sm:$0xff]  }
   0x2   :  { %v666_v1 = vld [vmem:[%s1007_s1 + $0x174] ss:$8 sps:$4 sm:$0xff]   ;;  %436 = vmatprep.subr.bf16.mxu0 %v664_v0  ;;  %v669_v3 = vld [vmem:[%s1007_s1 + $0x170] ss:$8 sps:$4 sm:$0xff]   ;;  %v672_v5 = vld [vmem:[%s1007_s1 + $0x164] ss:$8 sps:$4 sm:$0xff]  }
   0x3   :  { %479 = vmatprep.subr.bf16.mxu1 %v666_v1  ;;  %437 = vmatpush1.bf16.msra.mxu0 %v668_v2  ;;  %v674_v6 = vld [vmem:[%s1007_s1 + $0x60] ss:$8 sps:$4 sm:$0xff]   ;;  %v676_v8 = vld [vmem:[%s1007_s1 + $0x54] ss:$8 sps:$4 sm:$0xff]   ;;  %v680_v10 = vld [vmem:[%s1007_s1 + $0x50] ss:$8 sps:$4 sm:$0xff]  }
   0x4   :  { %480 = vmatpush1.bf16.msra.mxu1 %v669_v3  ;;  %438 = vmatprep.subr.bf16.mxu0 %v670_v4  ;;  %v675_v7 = vld [vmem:[%s1007_s1 + $0x160] ss:$8 sps:$4 sm:$0xff]   ;;  %v678_v9 = vld [vmem:[%s1007_s1 + $0x154] ss:$8 sps:$4 sm:$0xff]   ;;  %v681_v11 = vld [vmem:[%s1007_s1 + $0x150] ss:$8 sps:$4 sm:$0xff]   ;;  %v86_v4 = vlaneseq }
   0x5   :  { %481 = vmatprep.subr.bf16.mxu1 %v672_v5  ;;  %v682_v12 = vld [vmem:[%s1007_s1 + $0x44] ss:$8 sps:$4 sm:$0xff]   ;;  %v686_v14 = vld [vmem:[%s1007_s1 + $0x40] ss:$8 sps:$4 sm:$0xff]   ;;  %v688_v16 = vld [vmem:[%s1007_s1 + $0x34] ss:$8 sps:$4 sm:$0xff]  }
   0x6   :  { %v684_v13 = vld [vmem:[%s1007_s1 + $0x144] ss:$8 sps:$4 sm:$0xff]   ;;  %v687_v15 = vld [vmem:[%s1007_s1 + $0x140] ss:$8 sps:$4 sm:$0xff]   ;;  %v690_v17 = vld [vmem:[%s1007_s1 + $0x134] ss:$8 sps:$4 sm:$0xff]  }
   0x7   :  { %439 = vmatpush1.bf16.msra.mxu0 %v674_v6  ;;  %v692_v18 = vld [vmem:[%s1007_s1 + $0x30] ss:$8 sps:$4 sm:$0xff]   ;;  %v694_v20 = vld [vmem:[%s1007_s1 + $0x24] ss:$8 sps:$4 sm:$0xff]   ;;  %v698_v22 = vld [vmem:[%s1007_s1 + $0x20] ss:$8 sps:$4 sm:$0xff]  }
   0x8   :  { %482 = vmatpush1.bf16.msra.mxu1 %v675_v7  ;;  %440 = vmatprep.subr.bf16.mxu0 %v676_v8  ;;  %v693_v19 = vld [vmem:[%s1007_s1 + $0x130] ss:$8 sps:$4 sm:$0xff]   ;;  %v696_v21 = vld [vmem:[%s1007_s1 + $0x124] ss:$8 sps:$4 sm:$0xff]   ;;  %v699_v23 = vld [vmem:[%s1007_s1 + $0x120] ss:$8 sps:$4 sm:$0xff]  }
   0x9   :  { %483 = vmatprep.subr.bf16.mxu1 %v678_v9  ;;  %v700_v24 = vld [vmem:[%s1007_s1 + $0x14] ss:$8 sps:$4 sm:$0xff]   ;;  %v704_v26 = vld [vmem:[%s1007_s1 + $0x10] ss:$8 sps:$4 sm:$0xff]   ;;  %v706_v28 = vld [vmem:[%s1007_s1 + $0x4] ss:$8 sps:$4 sm:$0xff]  }
   0xa   :  { %v702_v25 = vld [vmem:[%s1007_s1 + $0x114] ss:$8 sps:$4 sm:$0xff]   ;;  %v705_v27 = vld [vmem:[%s1007_s1 + $0x110] ss:$8 sps:$4 sm:$0xff]   ;;  %v708_v29 = vld [vmem:[%s1007_s1 + $0x104] ss:$8 sps:$4 sm:$0xff]  }
   0xb   :  { %441 = vmatpush1.bf16.msra.mxu0 %v680_v10  ;;  %v710_v30 = vld [vmem:[%s1007_s1] ss:$8 sps:$4 sm:$0xff]   ;;  %v712_v32 = vld [vmem:[%s1007_s1 + $0xf4] ss:$8 sps:$4 sm:$0xff]   ;;  %v716_v34 = vld [vmem:[%s1007_s1 + $0xf0] ss:$8 sps:$4 sm:$0xff]  }
   0xc   :  { %484 = vmatpush1.bf16.msra.mxu1 %v681_v11  ;;  %442 = vmatprep.subr.bf16.mxu0 %v682_v12  ;;  %v711_v31 = vld [vmem:[%s1007_s1 + $0x100] ss:$8 sps:$4 sm:$0xff]   ;;  %v714_v33 = vld [vmem:[%s1007_s1 + $0x1f4] ss:$8 sps:$4 sm:$0xff]   ;;  %v717_v35 = vld [vmem:[%s1007_s1 + $0x1f0] ss:$8 sps:$4 sm:$0xff]  }
   0xd   :  { %485 = vmatprep.subr.bf16.mxu1 %v684_v13  ;;  %v718_v36 = vld [vmem:[%s1007_s1 + $0xe4] ss:$8 sps:$4 sm:$0xff]   ;;  %v722_v38 = vld [vmem:[%s1007_s1 + $0xe0] ss:$8 sps:$4 sm:$0xff]   ;;  %v724_v40 = vld [vmem:[%s1007_s1 + $0xd4] ss:$8 sps:$4 sm:$0xff]  }
   0xe   :  { %v720_v37 = vld [vmem:[%s1007_s1 + $0x1e4] ss:$8 sps:$4 sm:$0xff]   ;;  %v723_v39 = vld [vmem:[%s1007_s1 + $0x1e0] ss:$8 sps:$4 sm:$0xff]   ;;  %v726_v41 = vld [vmem:[%s1007_s1 + $0x1d4] ss:$8 sps:$4 sm:$0xff]  }
   0xf   :  { %443 = vmatpush1.bf16.msra.mxu0 %v686_v14  ;;  %v728_v42 = vld [vmem:[%s1007_s1 + $0xd0] ss:$8 sps:$4 sm:$0xff]   ;;  %v730_v44 = vld [vmem:[%s1007_s1 + $0xc4] ss:$8 sps:$4 sm:$0xff]   ;;  %v734_v46 = vld [vmem:[%s1007_s1 + $0xc0] ss:$8 sps:$4 sm:$0xff]  }
  0x10   :  { %486 = vmatpush1.bf16.msra.mxu1 %v687_v15  ;;  %444 = vmatprep.subr.bf16.mxu0 %v688_v16  ;;  %v729_v43 = vld [vmem:[%s1007_s1 + $0x1d0] ss:$8 sps:$4 sm:$0xff]   ;;  %v732_v45 = vld [vmem:[%s1007_s1 + $0x1c4] ss:$8 sps:$4 sm:$0xff]   ;;  %v735_v48 = vld [vmem:[%s1007_s1 + $0x1c0] ss:$8 sps:$4 sm:$0xff]  }
  0x11   :  { %487 = vmatprep.subr.bf16.mxu1 %v690_v17  ;;  %v762_v47 = vld [vmem:[%s1008_s0 + $0x4] ss:$16 sps:$4 sm:$0xff]   ;;  %v765_v51 = vld [vmem:[%s1008_s0 + $0xc] ss:$16 sps:$4 sm:$0xff]   ;;  %v740_v52 = vld [vmem:[%s1007_s1 + $0xb0] ss:$8 sps:$4 sm:$0xff]  }
  0x12   :  { %v736_v49 = vld [vmem:[%s1007_s1 + $0xb4] ss:$8 sps:$4 sm:$0xff]   ;;  %468 = vmatprep.mubr.bf16.mxu0 %v762_v47  ;;  %511 = vmatprep.mubr.bf16.mxu1 %v765_v51  ;;  %v741_v53 = vld [vmem:[%s1007_s1 + $0x1b0] ss:$8 sps:$4 sm:$0xff]   ;;  %v742_v54 = vld [vmem:[%s1007_s1 + $0xa4] ss:$8 sps:$4 sm:$0xff]  }
  0x13   :  { %445 = vmatpush1.bf16.msra.mxu0 %v692_v18  ;;  %v738_v50 = vld [vmem:[%s1007_s1 + $0x1b4] ss:$8 sps:$4 sm:$0xff]   ;;  %v744_v55 = vld [vmem:[%s1007_s1 + $0x1a4] ss:$8 sps:$4 sm:$0xff]   ;;  %v746_v56 = vld [vmem:[%s1007_s1 + $0xa0] ss:$8 sps:$4 sm:$0xff]  }
  0x14   :  { %488 = vmatpush1.bf16.msra.mxu1 %v693_v19  ;;  %446 = vmatprep.subr.bf16.mxu0 %v694_v20  ;;  %v747_v57 = vld [vmem:[%s1007_s1 + $0x1a0] ss:$8 sps:$4 sm:$0xff]   ;;  %v748_v58 = vld [vmem:[%s1007_s1 + $0x94] ss:$8 sps:$4 sm:$0xff]   ;;  %v752_v60 = vld [vmem:[%s1007_s1 + $0x90] ss:$8 sps:$4 sm:$0xff]  }
  0x15   :  { %489 = vmatprep.subr.bf16.mxu1 %v696_v21  ;;  %v750_v59 = vld [vmem:[%s1007_s1 + $0x194] ss:$8 sps:$4 sm:$0xff]   ;;  %v753_v61 = vld [vmem:[%s1007_s1 + $0x190] ss:$8 sps:$4 sm:$0xff]   ;;  %v754_v62 = vld [vmem:[%s1007_s1 + $0x84] ss:$8 sps:$4 sm:$0xff]  }
  0x16   :  { %v756_v63 = vld [vmem:[%s1007_s1 + $0x184] ss:$8 sps:$4 sm:$0xff]   ;;  %v758_v0 = vld [vmem:[%s1007_s1 + $0x80] ss:$8 sps:$4 sm:$0xff]   ;;  %v87_v5 = vshrl.u32 %v86_v4, 7 }
  0x17   :  { %447 = vmatpush1.bf16.msra.mxu0 %v698_v22  ;;  %v759_v1 = vld [vmem:[%s1007_s1 + $0x180] ss:$8 sps:$4 sm:$0xff]  }
  0x18   :  { %490 = vmatpush1.bf16.msra.mxu1 %v699_v23  ;;  %448 = vmatprep.subr.bf16.mxu0 %v700_v24  ;;  %v760_v2 = vld [vmem:[%s1008_s0] ss:$16 sps:$4 sm:$0xff]   ;;  %v763_v3 = vld [vmem:[%s1008_s0 + $0x8] ss:$16 sps:$4 sm:$0xff]   ;;  %v88_v6 = vsub.s32 0, %v87_v5  ;;  %v92_v8 = vsub.s32 1, %v87_v5 }
  0x19   :  { %491 = vmatprep.subr.bf16.mxu1 %v702_v25  ;;  %v84_v7 = vld [vmem:[%s1009_s2] sm:$0x3] }
  0x1a   :  { %v89_v9 = vrot.slane %v84_v7, %v88_v6  ;;  %v93_v10 = vrot.slane %v84_v7, %v92_v8 }
  0x1b   :  { %449 = vmatpush1.bf16.msra.mxu0 %v704_v26 }
  0x1c   :  { %492 = vmatpush1.bf16.msra.mxu1 %v705_v27  ;;  %450 = vmatprep.subr.bf16.mxu0 %v706_v28 }
  0x1d   :  { %493 = vmatprep.subr.bf16.mxu1 %v708_v29 }
  0x1f   :  { %451 = vmatpush1.bf16.msra.mxu0 %v710_v30 }
  0x20   :  { %494 = vmatpush1.bf16.msra.mxu1 %v711_v31  ;;  %452 = vmatprep.subr.bf16.mxu0 %v712_v32 }
  0x21   :  { %495 = vmatprep.subr.bf16.mxu1 %v714_v33 }
  0x23   :  { %453 = vmatpush2.bf16.msra.mxu0 %v716_v34 }
  0x24   :  { %496 = vmatpush2.bf16.msra.mxu1 %v717_v35  ;;  %454 = vmatprep.subr.bf16.mxu0 %v718_v36 }
  0x25   :  { %497 = vmatprep.subr.bf16.mxu1 %v720_v37 }
  0x27   :  { %455 = vmatpush2.bf16.msra.mxu0 %v722_v38 }
  0x28   :  { %498 = vmatpush2.bf16.msra.mxu1 %v723_v39  ;;  %456 = vmatprep.subr.bf16.mxu0 %v724_v40 }
  0x29   :  { %499 = vmatprep.subr.bf16.mxu1 %v726_v41 }
  0x2b   :  { %457 = vmatpush2.bf16.msra.mxu0 %v728_v42 }
  0x2c   :  { %500 = vmatpush2.bf16.msra.mxu1 %v729_v43  ;;  %458 = vmatprep.subr.bf16.mxu0 %v730_v44 }
  0x2d   :  { %501 = vmatprep.subr.bf16.mxu1 %v732_v45 }
  0x2f   :  { %459 = vmatpush2.bf16.msra.mxu0 %v734_v46 }
  0x30   :  { %502 = vmatpush2.bf16.msra.mxu1 %v735_v48  ;;  %460 = vmatprep.subr.bf16.mxu0 %v736_v49 }
  0x31   :  { %503 = vmatprep.subr.bf16.mxu1 %v738_v50 }
  0x33   :  { %461 = vmatpush2.bf16.msra.mxu0 %v740_v52 }
  0x34   :  { %504 = vmatpush2.bf16.msra.mxu1 %v741_v53  ;;  %462 = vmatprep.subr.bf16.mxu0 %v742_v54 }
  0x35   :  { %505 = vmatprep.subr.bf16.mxu1 %v744_v55 }
  0x37   :  { %463 = vmatpush2.bf16.msra.mxu0 %v746_v56 }
  0x38   :  { %506 = vmatpush2.bf16.msra.mxu1 %v747_v57  ;;  %464 = vmatprep.subr.bf16.mxu0 %v748_v58 }
  0x39   :  { %507 = vmatprep.subr.bf16.mxu1 %v750_v59 }
  0x3b   :  { %465 = vmatpush2.bf16.msra.mxu0 %v752_v60 }
  0x3c   :  { %508 = vmatpush2.bf16.msra.mxu1 %v753_v61  ;;  %466 = vmatprep.subr.bf16.mxu0 %v754_v62 }
  0x3d   :  { %509 = vmatprep.subr.bf16.mxu1 %v756_v63 }
  0x3f   :  { %467 = vmatpush2.bf16.msra.mxu0 %v758_v0 }
  0x40   :  { %510 = vmatpush2.bf16.msra.mxu1 %v759_v1 }
  0x42   :  { %469 = vmatmul.mubr.bf16.vlgmr.msra.gmra.mxu0 %v760_v2 }
  0x43   :  { %512 = vmatmul.mubr.bf16.vlgmr.msra.gmra.mxu1 %v763_v3 }
 0x102   :  { %v470_v11 = vpop.f32.mrf.mxu0 }
 0x103   :  { %v513_v12 = vpop.f32.mrf.mxu1  ;;  %v471_v13 = vadd.f32 %v470_v11, %v89_v9 }
 0x104   :  { %v472_v14 = vpop.f32.mrf.mxu0 }
 0x105   :  { %v515_v15 = vpop.f32.mrf.mxu1  ;;  %v473_v16 = vadd.f32 %v472_v14, %v93_v10  ;;  %v514_v19 = vadd.f32 %v513_v12, %v471_v13 }
 0x106   :  { %v474_v17 = vpop.f32.mrf.mxu0 }
 0x107   :  { %v517_v18 = vpop.f32.mrf.mxu1  ;;  %v516_v20 = vadd.f32 %v515_v15, %v473_v16  ;;  %v475_v21 = vadd.f32 %v474_v17, %v89_v9  ;;  %v550_v27 = vmul.f32 %v514_v19, %v514_v19 }
 0x108   :  { %v476_v22 = vpop.f32.mrf.mxu0 }
 0x109   :  { %v662_v23 = vpack.c.bf16 %v516_v20, %v514_v19  ;;  %v518_v24 = vadd.f32 %v517_v18, %v475_v21  ;;  %v477_v25 = vadd.f32 %v476_v22, %v93_v10  ;;  %v519_v26 = vpop.f32.mrf.mxu1  ;;  %v551_v35 = vmul.f32 %v516_v20, %v516_v20 }
 0x10b   :  { %534 = vst [vmem:[%s1010_s3] sm:$0xff] %v662_v23  ;;  %v536_v28 = vadd.f32 %v518_v24, %v514_v19  ;;  %v552_v29 = vmul.f32 %v518_v24, %v518_v24  ;;  %v520_v30 = vadd.f32 %v519_v26, %v477_v25 }
 0x10d   :  { %v537_v31 = vrot.slane %v536_v28, 4  ;;  %v554_v32 = vadd.f32 %v552_v29, %v550_v27  ;;  %v663_v33 = vpack.c.bf16 %v520_v30, %v518_v24  ;;  %v543_v34 = vadd.f32 %v520_v30, %v516_v20 }
 0x10e   :  { %v553_v36 = vmul.f32 %v520_v30, %v520_v30 }
 0x10f   :  { %v538_v37 = vadd.f32 %v537_v31, %v536_v28  ;;  %v555_v38 = vrot.slane %v554_v32, 4  ;;  %535 = vst [vmem:[%s1010_s3 + $0x8] sm:$0xff] %v663_v33  ;;  %v544_v39 = vrot.slane %v543_v34, 4 }
 0x110   :  { %v561_v40 = vadd.f32 %v553_v36, %v551_v35 }
 0x111   :  { %v539_v41 = vrot.slane %v538_v37, 2  ;;  %v556_v42 = vadd.f32 %v555_v38, %v554_v32  ;;  %v545_v43 = vadd.f32 %v544_v39, %v543_v34 }
 0x112   :  { %v562_v44 = vrot.slane %v561_v40, 4 }
 0x113   :  { %v557_v45 = vrot.slane %v556_v42, 2  ;;  %v546_v46 = vrot.slane %v545_v43, 2  ;;  %v540_v47 = vadd.f32 %v539_v41, %v538_v37 }
 0x114   :  { %v563_v48 = vadd.f32 %v562_v44, %v561_v40 }
 0x115   :  { %v558_v49 = vadd.f32 %v557_v45, %v556_v42  ;;  %v547_v50 = vadd.f32 %v546_v46, %v545_v43  ;;  %v541_v53 = vrot.slane %v540_v47, 1 }
 0x116   :  { %v564_v51 = vrot.slane %v563_v48, 2 }
 0x117   :  { %v559_v52 = vrot.slane %v558_v49, 1  ;;  %v548_v54 = vrot.slane %v547_v50, 1  ;;  %v542_v58 = vadd.f32 %v541_v53, %v540_v47 }
 0x118   :  { %v565_v55 = vadd.f32 %v564_v51, %v563_v48 }
 0x119   :  { %v560_v56 = vadd.f32 %v559_v52, %v558_v49  ;;  %v549_v59 = vadd.f32 %v548_v54, %v547_v50 }
 0x11a   :  { %v566_v57 = vrot.slane %v565_v55, 1 }
 0x11b   :  { %v569_v61 = vsel %vm568_vm0, %v542_v58, %v560_v56 }
 0x11c   :  { %v567_v60 = vadd.f32 %v566_v57, %v565_v55 }
 0x11e   :  { %v570_v62 = vsel %vm568_vm0, %v549_v59, %v567_v60 }
 0x11f   :  { %v573_v63 = vcombine.low %v569_v61, %v570_v62 }
 0x121   :  { %661 = vst.sshfl [vmem:[%s1011_s4] sm:$0x33 pattern:$0x76325410] %v573_v63 }

// kernel: tile.21
= control target key start
LH: loop header
LB: loop body
LE: loop exit
PB: predicated region body
PF: predicated region fallthrough
CT: control target
= control target key end

     0   :  { %s28_s0 = inlined_call_operand.vmem [shape: f32[64], index: 0, kind: input, shape index: {}]   ;;  %s29_s1 = inlined_call_operand.vmem [shape: f32[16,64], index: 1, kind: output, shape index: {}]  }
   0x1   :  { %v4_v0 = vld [vmem:[%s28_s0] ss:$0 sm:$0xff] }
   0x2   :  { %5 = vst [vmem:[%s29_s1] sm:$0xff] %v4_v0  ;;  %8 = vst [vmem:[%s29_s1 + $0x8] sm:$0xff] %v4_v0 }

// kernel: tile.23
= control target key start
LH: loop header
LB: loop body
LE: loop exit
PB: predicated region body
PF: predicated region fallthrough
CT: control target
= control target key end

     0   :  { %vm3_vm0 = vcmask 523264   ;;  %vm10_vm1 = vcmask 1048064   ;;  %s125_s0 = inlined_call_operand.vmem [shape: f32[16,64], index: 0, kind: input, shape index: {}]   ;;  %s126_s1 = inlined_call_operand.vmem [shape: f32[1,1024], index: 1, kind: output, shape index: {}]  }
   0x1   :  { %v75_v0 = vld [vmem:[%s125_s0 + $0x1] ss:$2 sm:$0xff]   ;;  %v2_v1 = vld [vmem:[%s125_s0] ss:$2 sm:$0xff]   ;;  %s84_s0 = smov 64  }
   0x2   :  { %8 = vrot.lane.b32.xlu0 %v75_v0, %s84_s0  ;;  %4 = vst.msk [vmem:[#allocation0] ss:$8 sm:$0xf] %vm3_vm0, %v2_v1   ;;  %5 = vst.msk [vmem:[#allocation0] ss:$8 sm:$0xf0] %vm3_vm0, %v2_v1  }
  0x74   :  { %v9_v2 = vpop.permute.xlu0 %8  }
  0x75   :  { %11 = vst.msk [vmem:[#allocation0] ss:$8 sm:$0xf] %vm10_vm1, %v9_v2   ;;  %12 = vst.msk [vmem:[#allocation0] ss:$8 sm:$0xf0] %vm10_vm1, %v9_v2  }
  0x7c   :  { %v17_v3 = vld [vmem:[#allocation0] sm:$0x1]  ;;  %v22_v4 = vld [vmem:[#allocation0 + $0x8] sm:$0x1]  ;;  %v28_v5 = vld [vmem:[#allocation0 + $0x10] sm:$0x1] }
  0x7d   :  { %20 = vst [vmem:[%s126_s1] sm:$0x1] %v17_v3  ;;  %76 = vst [vmem:[%s126_s1 + $0x1] sm:$0x1] %v22_v4  ;;  %v35_v6 = vld [vmem:[#allocation0 + $0x18] sm:$0x1] }
  0x7e   :  { %77 = vst [vmem:[%s126_s1 + $0x2] sm:$0x1] %v28_v5  ;;  %v42_v7 = vld [vmem:[#allocation0 + $0x20] sm:$0x1]  ;;  %v49_v8 = vld [vmem:[#allocation0 + $0x28] sm:$0x1] }
  0x7f   :  { %78 = vst [vmem:[%s126_s1 + $0x3] sm:$0x1] %v35_v6  ;;  %79 = vst [vmem:[%s126_s1 + $0x4] sm:$0x1] %v42_v7  ;;  %v56_v9 = vld [vmem:[#allocation0 + $0x30] sm:$0x1] }
  0x80   :  { %80 = vst [vmem:[%s126_s1 + $0x5] sm:$0x1] %v49_v8  ;;  %v63_v10 = vld [vmem:[#allocation0 + $0x38] sm:$0x1]  ;;  %81 = vst [vmem:[%s126_s1 + $0x6] sm:$0x1] %v56_v9 }
  0x81   :  { %82 = vst [vmem:[%s126_s1 + $0x7] sm:$0x1] %v63_v10 }

// kernel: forward.6
= control target key start
LH: loop header
LB: loop body
LE: loop exit
PB: predicated region body
PF: predicated region fallthrough
CT: control target
= control target key end

     0   :  { %v396_v1 = vmov 0   ;;  %v81_v43 = vlaneseq  ;;  %vm296_vm0 = vcmask 1040384   ;;  %s510_s3 = inlined_call_operand.vmem [shape: bf16[128,256], index: 3, kind: input, shape index: {}]   ;;  %s511_s0 = inlined_call_operand.vmem [shape: bf16[32,128], index: 0, kind: input, shape index: {}]   ;;  %s512_s1 = inlined_call_operand.vmem [shape: f32[1,128], index: 1, kind: input, shape index: {}]   ;;  %s513_s2 = inlined_call_operand.vmem [shape: f32[1,128], index: 2, kind: input, shape index: {}]   ;;  %s514_s4 = inlined_call_operand.vmem [shape: f32[1,256], index: 4, kind: input, shape index: {}]   ;;  %s515_s5 = inlined_call_operand.vmem [shape: bf16[32,256], index: 5, kind: output, shape index: {0}]   ;;  %s516_s6 = inlined_call_operand.vmem [shape: f32[1,2,256], index: 6, kind: output, shape index: {1}]  }
   0x1   :  { %v372_v0 = vld [vmem:[%s510_s3 + $0x74] ss:$8 sps:$4 sm:$0xff]   ;;  %203 = vmatprep.mubr.bf16.mxu0 %v396_v1  ;;  %213 = vmatprep.mubr.bf16.mxu1 %v396_v1  ;;  %v374_v2 = vld [vmem:[%s510_s3 + $0x70] ss:$8 sps:$4 sm:$0xff]   ;;  %v375_v3 = vld [vmem:[%s510_s3 + $0x64] ss:$8 sps:$4 sm:$0xff]  }
   0x2   :  { %171 = vmatprep.subr.bf16.mxu0 %v372_v0  ;;  %355 = vmatprep.subr.bf16.mxu1 %v372_v0  ;;  %v377_v4 = vld [vmem:[%s510_s3 + $0x60] ss:$8 sps:$4 sm:$0xff]   ;;  %v378_v5 = vld [vmem:[%s510_s3 + $0x54] ss:$8 sps:$4 sm:$0xff]   ;;  %v380_v6 = vld [vmem:[%s510_s3 + $0x50] ss:$8 sps:$4 sm:$0xff]  }
   0x3   :  { %172 = vmatpush1.bf16.msra.mxu0 %v374_v2  ;;  %363 = vmatpush1.bf16.msra.mxu1 %v374_v2  ;;  %v381_v7 = vld [vmem:[%s510_s3 + $0x44] ss:$8 sps:$4 sm:$0xff]   ;;  %v383_v9 = vld [vmem:[%s510_s3 + $0x40] ss:$8 sps:$4 sm:$0xff]   ;;  %v384_v14 = vld [vmem:[%s510_s3 + $0x34] ss:$8 sps:$4 sm:$0xff]  }
   0x4   :  { %173 = vmatprep.subr.bf16.mxu0 %v375_v3  ;;  %356 = vmatprep.subr.bf16.mxu1 %v375_v3  ;;  %v347_v8 = vld [vmem:[%s511_s0] sm:$0xff]   ;;  %v354_v13 = vld [vmem:[%s511_s0 + $0x8] sm:$0xff]   ;;  %v386_v22 = vld [vmem:[%s510_s3 + $0x30] ss:$8 sps:$4 sm:$0xff]   ;;  %v82_v44 = vshrl.u32 %v81_v43, 7 }
   0x5   :  { %v348_v10 = vunpack.c.l.bf16 %v347_v8  ;;  %v349_v11 = vunpack.c.h.bf16 %v347_v8  ;;  %v319_v12 = vld [vmem:[%s512_s1] ss:$0 sm:$0xff]  ;;  %v352_v15 = vunpack.c.l.bf16 %v354_v13  ;;  %v353_v16 = vunpack.c.h.bf16 %v354_v13  ;;  %v387_v23 = vld [vmem:[%s510_s3 + $0x24] ss:$8 sps:$4 sm:$0xff]   ;;  %v390_v29 = vld [vmem:[%s510_s3 + $0x14] ss:$8 sps:$4 sm:$0xff]  }
   0x6   :  { %v320_v19 = vld [vmem:[%s513_s2] ss:$0 sm:$0xff]  ;;  %v392_v34 = vld [vmem:[%s510_s3 + $0x10] ss:$8 sps:$4 sm:$0xff]   ;;  %v393_v35 = vld [vmem:[%s510_s3 + $0x4] ss:$8 sps:$4 sm:$0xff]  }
   0x7   :  { %174 = vmatpush1.bf16.msra.mxu0 %v377_v4  ;;  %364 = vmatpush1.bf16.msra.mxu1 %v377_v4  ;;  %v38_v17 = vmul.f32 %v348_v10, %v319_v12  ;;  %v39_v18 = vmul.f32 %v349_v11, %v319_v12  ;;  %v40_v20 = vmul.f32 %v352_v15, %v319_v12  ;;  %v389_v28 = vld [vmem:[%s510_s3 + $0x20] ss:$8 sps:$4 sm:$0xff]   ;;  %v83_v45 = vsub.s32 0, %v82_v44 }
   0x8   :  { %175 = vmatprep.subr.bf16.mxu0 %v378_v5  ;;  %357 = vmatprep.subr.bf16.mxu1 %v378_v5  ;;  %v41_v21 = vmul.f32 %v353_v16, %v319_v12  ;;  %v395_v40 = vld [vmem:[%s510_s3] ss:$8 sps:$4 sm:$0xff]   ;;  %v87_v46 = vsub.s32 1, %v82_v44 }
   0x9   :  { %v49_v24 = vadd.f32 %v320_v19, %v38_v17  ;;  %v50_v25 = vadd.f32 %v320_v19, %v39_v18  ;;  %v51_v26 = vadd.f32 %v320_v19, %v40_v20  ;;  %v79_v47 = vld [vmem:[%s514_s4] sm:$0x3] }
   0xa   :  { %v52_v27 = vadd.f32 %v320_v19, %v41_v21  ;;  %v84_v48 = vrot.slane %v79_v47, %v83_v45  ;;  %v88_v49 = vrot.slane %v79_v47, %v87_v46 }
   0xb   :  { %176 = vmatpush1.bf16.msra.mxu0 %v380_v6  ;;  %365 = vmatpush1.bf16.msra.mxu1 %v380_v6  ;;  %v53_v30 = vmul.f32 0.2, %v49_v24  ;;  %v54_v31 = vmul.f32 0.2, %v50_v25  ;;  %v55_v32 = vmul.f32 0.2, %v51_v26 }
   0xc   :  { %177 = vmatprep.subr.bf16.mxu0 %v381_v7  ;;  %358 = vmatprep.subr.bf16.mxu1 %v381_v7  ;;  %v56_v33 = vmul.f32 0.2, %v52_v27 }
   0xd   :  { %v57_v36 = vmax.f32 %v49_v24, %v53_v30  ;;  %v58_v37 = vmax.f32 %v50_v25, %v54_v31  ;;  %v59_v38 = vmax.f32 %v51_v26, %v55_v32 }
   0xe   :  { %v60_v39 = vmax.f32 %v52_v27, %v56_v33 }
   0xf   :  { %178 = vmatpush1.bf16.msra.mxu0 %v383_v9  ;;  %366 = vmatpush1.bf16.msra.mxu1 %v383_v9  ;;  %v61_v41 = vpack.c.bf16 %v58_v37, %v57_v36 }
  0x10   :  { %179 = vmatprep.subr.bf16.mxu0 %v384_v14  ;;  %359 = vmatprep.subr.bf16.mxu1 %v384_v14  ;;  %v62_v42 = vpack.c.bf16 %v60_v39, %v59_v38 }
  0x13   :  { %180 = vmatpush1.bf16.msra.mxu0 %v386_v22  ;;  %367 = vmatpush1.bf16.msra.mxu1 %v386_v22 }
  0x14   :  { %181 = vmatprep.subr.bf16.mxu0 %v387_v23  ;;  %360 = vmatprep.subr.bf16.mxu1 %v387_v23 }
  0x17   :  { %182 = vmatpush1.bf16.msra.mxu0 %v389_v28  ;;  %368 = vmatpush1.bf16.msra.mxu1 %v389_v28 }
  0x18   :  { %183 = vmatprep.subr.bf16.mxu0 %v390_v29  ;;  %361 = vmatprep.subr.bf16.mxu1 %v390_v29 }
  0x1b   :  { %184 = vmatpush1.bf16.msra.mxu0 %v392_v34  ;;  %369 = vmatpush1.bf16.msra.mxu1 %v392_v34 }
  0x1c   :  { %185 = vmatprep.subr.bf16.mxu0 %v393_v35  ;;  %362 = vmatprep.subr.bf16.mxu1 %v393_v35 }
  0x1f   :  { %186 = vmatpush1.bf16.msra.mxu0 %v395_v40  ;;  %370 = vmatpush1.bf16.msra.mxu1 %v395_v40 }
  0x22   :  { %204 = vmatmul.mubr.bf16.vlgmr.msra.gmra.mxu0 %v61_v41  ;;  %214 = vmatmul.mubr.bf16.vlgmr.msra.gmra.mxu1 %v62_v42 }
  0xe2   :  { %v205_v50 = vpop.f32.mrf.mxu0  ;;  %v215_v51 = vpop.f32.mrf.mxu1 }
  0xe3   :  { %v216_v52 = vadd.f32 %v215_v51, %v84_v48  ;;  %v206_v55 = vadd.f32 %v205_v50, %v84_v48 }
  0xe4   :  { %v207_v53 = vpop.f32.mrf.mxu0  ;;  %v217_v54 = vpop.f32.mrf.mxu1 }
  0xe5   :  { %v208_v56 = vadd.f32 %v207_v53, %v88_v49  ;;  %v218_v57 = vadd.f32 %v217_v54, %v88_v49  ;;  %v270_v4 = vmul.f32 %v206_v55, %v206_v55  ;;  %v274_v12 = vmul.f32 %v216_v52, %v216_v52 }
  0xe6   :  { %v209_v58 = vpop.f32.mrf.mxu0  ;;  %v219_v59 = vpop.f32.mrf.mxu1 }
  0xe7   :  { %v342_v60 = vpack.c.bf16 %v208_v56, %v206_v55  ;;  %v344_v61 = vpack.c.bf16 %v218_v57, %v216_v52  ;;  %v210_v62 = vadd.f32 %v209_v58, %v84_v48  ;;  %v220_v1 = vadd.f32 %v219_v59, %v84_v48 }
  0xe8   :  { %v211_v63 = vpop.f32.mrf.mxu0  ;;  %v221_v0 = vpop.f32.mrf.mxu1  ;;  %v271_v5 = vmul.f32 %v208_v56, %v208_v56  ;;  %v275_v15 = vmul.f32 %v218_v57, %v218_v57 }
  0xe9   :  { %248 = vst [vmem:[%s515_s5] sm:$0xff] %v342_v60  ;;  %250 = vst [vmem:[%s515_s5 + $0x10] sm:$0xff] %v344_v61  ;;  %v212_v2 = vadd.f32 %v211_v63, %v88_v49  ;;  %v222_v3 = vadd.f32 %v221_v0, %v88_v49  ;;  %v252_v6 = vadd.f32 %v210_v62, %v206_v55 }
  0xea   :  { %v272_v7 = vmul.f32 %v210_v62, %v210_v62  ;;  %v276_v19 = vmul.f32 %v220_v1, %v220_v1 }
  0xeb   :  { %v343_v8 = vpack.c.bf16 %v212_v2, %v210_v62  ;;  %v261_v9 = vadd.f32 %v212_v2, %v208_v56  ;;  %v273_v10 = vmul.f32 %v212_v2, %v212_v2  ;;  %v345_v11 = vpack.c.bf16 %v222_v3, %v220_v1 }
  0xec   :  { %v278_v13 = vadd.f32 %v272_v7, %v270_v4  ;;  %v253_v14 = vadd.f32 %v252_v6, %v216_v52  ;;  %v277_v22 = vmul.f32 %v222_v3, %v222_v3 }
  0xed   :  { %249 = vst [vmem:[%s515_s5 + $0x8] sm:$0xff] %v343_v8  ;;  %v287_v16 = vadd.f32 %v273_v10, %v271_v5  ;;  %251 = vst [vmem:[%s515_s5 + $0x18] sm:$0xff] %v345_v11  ;;  %v262_v17 = vadd.f32 %v261_v9, %v218_v57 }
  0xee   :  { %v254_v18 = vadd.f32 %v253_v14, %v220_v1  ;;  %v279_v20 = vadd.f32 %v278_v13, %v274_v12 }
  0xef   :  { %v263_v21 = vadd.f32 %v262_v17, %v222_v3  ;;  %v288_v23 = vadd.f32 %v287_v16, %v275_v15 }
  0xf0   :  { %v255_v24 = vrot.slane %v254_v18, 4  ;;  %v280_v25 = vadd.f32 %v279_v20, %v276_v19 }
  0xf1   :  { %v264_v26 = vrot.slane %v263_v21, 4  ;;  %v289_v27 = vadd.f32 %v288_v23, %v277_v22 }
  0xf2   :  { %v256_v28 = vadd.f32 %v255_v24, %v254_v18  ;;  %v281_v29 = vrot.slane %v280_v25, 4 }
  0xf3   :  { %v265_v30 = vadd.f32 %v264_v26, %v263_v21  ;;  %v290_v31 = vrot.slane %v289_v27, 4 }
  0xf4   :  { %v257_v32 = vrot.slane %v256_v28, 2  ;;  %v282_v33 = vadd.f32 %v281_v29, %v280_v25 }
  0xf5   :  { %v266_v34 = vrot.slane %v265_v30, 2  ;;  %v291_v35 = vadd.f32 %v290_v31, %v289_v27 }
  0xf6   :  { %v258_v36 = vadd.f32 %v257_v32, %v256_v28  ;;  %v283_v37 = vrot.slane %v282_v33, 2 }
  0xf7   :  { %v267_v38 = vadd.f32 %v266_v34, %v265_v30  ;;  %v292_v39 = vrot.slane %v291_v35, 2 }
  0xf8   :  { %v284_v40 = vadd.f32 %v283_v37, %v282_v33  ;;  %v259_v41 = vrot.slane %v258_v36, 1 }
  0xf9   :  { %v268_v42 = vrot.slane %v267_v38, 1  ;;  %v293_v43 = vadd.f32 %v292_v39, %v291_v35 }
  0xfa   :  { %v285_v44 = vrot.slane %v284_v40, 1  ;;  %v260_v47 = vadd.f32 %v259_v41, %v258_v36 }
  0xfb   :  { %v294_v45 = vrot.slane %v293_v43, 1  ;;  %v269_v48 = vadd.f32 %v268_v42, %v267_v38 }
  0xfc   :  { %v286_v46 = vadd.f32 %v285_v44, %v284_v40 }
  0xfd   :  { %v295_v49 = vadd.f32 %v294_v45, %v293_v43 }
  0xfe   :  { %v297_v50 = vsel %vm296_vm0, %v260_v47, %v286_v46 }
  0xff   :  { %v298_v51 = vsel %vm296_vm0, %v269_v48, %v295_v49 }
 0x100   :  { %v301_v52 = vcombine.low %v297_v50, %v298_v51 }
 0x102   :  { %341 = vst.sshfl [vmem:[%s516_s6] sm:$0x33 pattern:$0x76325410] %v301_v52 }

// kernel: forward.7
= control target key start
LH: loop header
LB: loop body
LE: loop exit
PB: predicated region body
PF: predicated region fallthrough
CT: control target
= control target key end

     0   :  { %v34_v37 = vlaneseq  ;;  %s1933_s3 = inlined_call_operand.vmem [shape: bf16[1024,256], index: 3, kind: input, shape index: {}]   ;;  %s1934_s0 = inlined_call_operand.vmem [shape: bf16[8,1024], index: 0, kind: input, shape index: {}]   ;;  %s1935_s1 = inlined_call_operand.vmem [shape: f32[1,1024], index: 1, kind: input, shape index: {}]   ;;  %s1936_s2 = inlined_call_operand.vmem [shape: f32[1,1024], index: 2, kind: input, shape index: {}]   ;;  %s1937_s4 = inlined_call_operand.vmem [shape: f32[1,256], index: 4, kind: input, shape index: {}]   ;;  %s1938_s5 = inlined_call_operand.vmem [shape: f32[8,256], index: 5, kind: output, shape index: {}]  }
   0x1   :  { %v1236_v0 = vld [vmem:[%s1933_s3 + $0x74] ss:$8 sps:$4 sm:$0xff]   ;;  %v1240_v2 = vld [vmem:[%s1933_s3 + $0x70] ss:$8 sps:$4 sm:$0xff]   ;;  %v1242_v4 = vld [vmem:[%s1933_s3 + $0x64] ss:$8 sps:$4 sm:$0xff]  }
   0x2   :  { %v1238_v1 = vld [vmem:[%s1933_s3 + $0x174] ss:$8 sps:$4 sm:$0xff]   ;;  %936 = vmatprep.subr.bf16.mxu0 %v1236_v0  ;;  %v1241_v3 = vld [vmem:[%s1933_s3 + $0x170] ss:$8 sps:$4 sm:$0xff]   ;;  %v1244_v5 = vld [vmem:[%s1933_s3 + $0x164] ss:$8 sps:$4 sm:$0xff]  }
   0x3   :  { %977 = vmatprep.subr.bf16.mxu1 %v1238_v1  ;;  %937 = vmatpush1.bf16.msra.mxu0 %v1240_v2  ;;  %v1246_v6 = vld [vmem:[%s1933_s3 + $0x60] ss:$8 sps:$4 sm:$0xff]   ;;  %v1248_v8 = vld [vmem:[%s1933_s3 + $0x54] ss:$8 sps:$4 sm:$0xff]   ;;  %v1252_v10 = vld [vmem:[%s1933_s3 + $0x50] ss:$8 sps:$4 sm:$0xff]  }
   0x4   :  { %978 = vmatpush1.bf16.msra.mxu1 %v1241_v3  ;;  %938 = vmatprep.subr.bf16.mxu0 %v1242_v4  ;;  %v1247_v7 = vld [vmem:[%s1933_s3 + $0x160] ss:$8 sps:$4 sm:$0xff]   ;;  %v1250_v9 = vld [vmem:[%s1933_s3 + $0x154] ss:$8 sps:$4 sm:$0xff]   ;;  %v1253_v11 = vld [vmem:[%s1933_s3 + $0x150] ss:$8 sps:$4 sm:$0xff]  }
   0x5   :  { %979 = vmatprep.subr.bf16.mxu1 %v1244_v5  ;;  %v1254_v12 = vld [vmem:[%s1933_s3 + $0x44] ss:$8 sps:$4 sm:$0xff]   ;;  %v1258_v14 = vld [vmem:[%s1933_s3 + $0x40] ss:$8 sps:$4 sm:$0xff]   ;;  %v1260_v16 = vld [vmem:[%s1933_s3 + $0x34] ss:$8 sps:$4 sm:$0xff]  }
   0x6   :  { %v1256_v13 = vld [vmem:[%s1933_s3 + $0x144] ss:$8 sps:$4 sm:$0xff]   ;;  %v1259_v15 = vld [vmem:[%s1933_s3 + $0x140] ss:$8 sps:$4 sm:$0xff]   ;;  %v1262_v17 = vld [vmem:[%s1933_s3 + $0x134] ss:$8 sps:$4 sm:$0xff]  }
   0x7   :  { %939 = vmatpush1.bf16.msra.mxu0 %v1246_v6  ;;  %v1264_v18 = vld [vmem:[%s1933_s3 + $0x30] ss:$8 sps:$4 sm:$0xff]   ;;  %v1266_v20 = vld [vmem:[%s1933_s3 + $0x24] ss:$8 sps:$4 sm:$0xff]   ;;  %v1270_v22 = vld [vmem:[%s1933_s3 + $0x20] ss:$8 sps:$4 sm:$0xff]  }
   0x8   :  { %980 = vmatpush1.bf16.msra.mxu1 %v1247_v7  ;;  %940 = vmatprep.subr.bf16.mxu0 %v1248_v8  ;;  %v1265_v19 = vld [vmem:[%s1933_s3 + $0x130] ss:$8 sps:$4 sm:$0xff]   ;;  %v1268_v21 = vld [vmem:[%s1933_s3 + $0x124] ss:$8 sps:$4 sm:$0xff]   ;;  %v1271_v23 = vld [vmem:[%s1933_s3 + $0x120] ss:$8 sps:$4 sm:$0xff]  }
   0x9   :  { %981 = vmatprep.subr.bf16.mxu1 %v1250_v9  ;;  %v1272_v24 = vld [vmem:[%s1933_s3 + $0x14] ss:$8 sps:$4 sm:$0xff]   ;;  %v1276_v26 = vld [vmem:[%s1933_s3 + $0x10] ss:$8 sps:$4 sm:$0xff]   ;;  %v1278_v28 = vld [vmem:[%s1933_s3 + $0x4] ss:$8 sps:$4 sm:$0xff]  }
   0xa   :  { %v1274_v25 = vld [vmem:[%s1933_s3 + $0x114] ss:$8 sps:$4 sm:$0xff]   ;;  %v1277_v27 = vld [vmem:[%s1933_s3 + $0x110] ss:$8 sps:$4 sm:$0xff]   ;;  %v1280_v29 = vld [vmem:[%s1933_s3 + $0x104] ss:$8 sps:$4 sm:$0xff]  }
   0xb   :  { %941 = vmatpush1.bf16.msra.mxu0 %v1252_v10  ;;  %v1282_v30 = vld [vmem:[%s1933_s3] ss:$8 sps:$4 sm:$0xff]   ;;  %v1284_v32 = vld [vmem:[%s1933_s3 + $0xf4] ss:$8 sps:$4 sm:$0xff]   ;;  %v1288_v34 = vld [vmem:[%s1933_s3 + $0xf0] ss:$8 sps:$4 sm:$0xff]  }
   0xc   :  { %982 = vmatpush1.bf16.msra.mxu1 %v1253_v11  ;;  %942 = vmatprep.subr.bf16.mxu0 %v1254_v12  ;;  %v1283_v31 = vld [vmem:[%s1933_s3 + $0x100] ss:$8 sps:$4 sm:$0xff]   ;;  %v1286_v33 = vld [vmem:[%s1933_s3 + $0x1f4] ss:$8 sps:$4 sm:$0xff]   ;;  %v1289_v35 = vld [vmem:[%s1933_s3 + $0x1f0] ss:$8 sps:$4 sm:$0xff]  }
   0xd   :  { %983 = vmatprep.subr.bf16.mxu1 %v1256_v13  ;;  %v1290_v36 = vld [vmem:[%s1933_s3 + $0xe4] ss:$8 sps:$4 sm:$0xff]   ;;  %v1294_v39 = vld [vmem:[%s1933_s3 + $0xe0] ss:$8 sps:$4 sm:$0xff]   ;;  %v1296_v41 = vld [vmem:[%s1933_s3 + $0xd4] ss:$8 sps:$4 sm:$0xff]  }
   0xe   :  { %v1292_v38 = vld [vmem:[%s1933_s3 + $0x1e4] ss:$8 sps:$4 sm:$0xff]   ;;  %v1295_v40 = vld [vmem:[%s1933_s3 + $0x1e0] ss:$8 sps:$4 sm:$0xff]   ;;  %v1585_v42 = vshrl.u32 %v34_v37, 7 }
   0xf   :  { %943 = vmatpush1.bf16.msra.mxu0 %v1258_v14  ;;  %v1298_v43 = vld [vmem:[%s1933_s3 + $0x1d4] ss:$8 sps:$4 sm:$0xff]   ;;  %v1300_v44 = vld [vmem:[%s1933_s3 + $0xd0] ss:$8 sps:$4 sm:$0xff]   ;;  %v1302_v46 = vld [vmem:[%s1933_s3 + $0xc4] ss:$8 sps:$4 sm:$0xff]  }
  0x10   :  { %984 = vmatpush1.bf16.msra.mxu1 %v1259_v15  ;;  %944 = vmatprep.subr.bf16.mxu0 %v1260_v16  ;;  %v1301_v45 = vld [vmem:[%s1933_s3 + $0x1d0] ss:$8 sps:$4 sm:$0xff]   ;;  %v1600_v47 = vsub.s32 1, %v1585_v42  ;;  %v1304_v48 = vld [vmem:[%s1933_s3 + $0x1c4] ss:$8 sps:$4 sm:$0xff]   ;;  %v48_v49 = vsub.s32 3, %v1585_v42 }
  0x11   :  { %985 = vmatprep.subr.bf16.mxu1 %v1262_v17  ;;  %v1607_v50 = vsub.s32 0, %v1585_v42  ;;  %v1306_v51 = vld [vmem:[%s1933_s3 + $0xc0] ss:$8 sps:$4 sm:$0xff]   ;;  %v44_v54 = vsub.s32 2, %v1585_v42  ;;  %v1308_v60 = vld [vmem:[%s1933_s3 + $0xb4] ss:$8 sps:$4 sm:$0xff]  }
  0x12   :  { %v1307_v52 = vld [vmem:[%s1933_s3 + $0x1c0] ss:$8 sps:$4 sm:$0xff]   ;;  %v1310_v1 = vld [vmem:[%s1933_s3 + $0x1b4] ss:$8 sps:$4 sm:$0xff]   ;;  %v52_v8 = vsub.s32 4, %v1585_v42  ;;  %v60_v14 = vsub.s32 6, %v1585_v42 }
  0x13   :  { %945 = vmatpush1.bf16.msra.mxu0 %v1264_v18  ;;  %v20_v53 = vld [vmem:[%s1934_s0] sm:$0xff]  ;;  %v21_v59 = vld [vmem:[%s1934_s0 + $0x8] sm:$0xff]  ;;  %v1312_v9 = vld [vmem:[%s1933_s3 + $0xb0] ss:$8 sps:$4 sm:$0xff]  }
  0x14   :  { %986 = vmatpush1.bf16.msra.mxu1 %v1265_v19  ;;  %946 = vmatprep.subr.bf16.mxu0 %v1266_v20  ;;  %v24_v55 = vunpack.c.l.bf16 %v20_v53  ;;  %v25_v56 = vunpack.c.h.bf16 %v20_v53  ;;  %v1622_v57 = vld [vmem:[%s1935_s1] sm:$0xff]  ;;  %v26_v63 = vunpack.c.l.bf16 %v21_v59  ;;  %v27_v0 = vunpack.c.h.bf16 %v21_v59  ;;  %v1313_v10 = vld [vmem:[%s1933_s3 + $0x1b0] ss:$8 sps:$4 sm:$0xff]  }
  0x15   :  { %987 = vmatprep.subr.bf16.mxu1 %v1268_v21  ;;  %v1627_v58 = vld [vmem:[%s1936_s2] sm:$0xff]  ;;  %v41_v61 = vrot.slane %v1622_v57, %v1600_v47  ;;  %v49_v2 = vrot.slane %v1622_v57, %v48_v49  ;;  %v37_v4 = vrot.slane %v1622_v57, %v1607_v50  ;;  %v45_v7 = vrot.slane %v1622_v57, %v44_v54  ;;  %v1332_v53 = vld [vmem:[%s1933_s3 + $0x270] ss:$8 sps:$4 sm:$0xff]  }
  0x16   :  { %v91_v62 = vrot.slane %v1627_v58, %v1600_v47  ;;  %v99_v3 = vrot.slane %v1627_v58, %v48_v49  ;;  %v87_v6 = vrot.slane %v1627_v58, %v1607_v50  ;;  %v95_v13 = vrot.slane %v1627_v58, %v44_v54  ;;  %v1314_v15 = vld [vmem:[%s1933_s3 + $0xa4] ss:$8 sps:$4 sm:$0xff]   ;;  %v1337_v49 = vld [vmem:[%s1933_s3 + $0x374] ss:$8 sps:$4 sm:$0xff]   ;;  %v1335_v54 = vld [vmem:[%s1933_s3 + $0x370] ss:$8 sps:$4 sm:$0xff]  }
  0x17   :  { %947 = vmatpush1.bf16.msra.mxu0 %v1270_v22  ;;  %v75_v5 = vmul.f32 %v41_v61, %v25_v56  ;;  %v77_v11 = vmul.f32 %v49_v2, %v27_v0  ;;  %v74_v12 = vmul.f32 %v37_v4, %v24_v55  ;;  %v76_v17 = vmul.f32 %v45_v7, %v26_v63  ;;  %v1316_v18 = vld [vmem:[%s1933_s3 + $0x1a4] ss:$8 sps:$4 sm:$0xff]   ;;  %v1338_v59 = vld [vmem:[%s1933_s3 + $0x260] ss:$8 sps:$4 sm:$0xff]   ;;  %v1346_v61 = vld [vmem:[%s1933_s3 + $0x254] ss:$8 sps:$4 sm:$0xff]  }
  0x18   :  { %988 = vmatpush1.bf16.msra.mxu1 %v1271_v23  ;;  %948 = vmatprep.subr.bf16.mxu0 %v1272_v24  ;;  %v1665_v22 = vrot.slane %v1622_v57, %v52_v8  ;;  %v1668_v23 = vrot.slane %v1627_v58, %v52_v8  ;;  %v1340_v55 = vld [vmem:[%s1933_s3 + $0x264] ss:$8 sps:$4 sm:$0xff]   ;;  %v1344_v63 = vld [vmem:[%s1933_s3 + $0x250] ss:$8 sps:$4 sm:$0xff]   ;;  %v1353_v4 = vld [vmem:[%s1933_s3 + $0x340] ss:$8 sps:$4 sm:$0xff]  }
  0x19   :  { %989 = vmatprep.subr.bf16.mxu1 %v1274_v25  ;;  %v125_v16 = vadd.f32 %v91_v62, %v75_v5  ;;  %v127_v19 = vadd.f32 %v99_v3, %v77_v11  ;;  %v124_v21 = vadd.f32 %v87_v6, %v74_v12  ;;  %v126_v25 = vadd.f32 %v95_v13, %v76_v17  ;;  %v1343_v56 = vld [vmem:[%s1933_s3 + $0x364] ss:$8 sps:$4 sm:$0xff]   ;;  %v1349_v62 = vld [vmem:[%s1933_s3 + $0x354] ss:$8 sps:$4 sm:$0xff]   ;;  %v1347_v0 = vld [vmem:[%s1933_s3 + $0x350] ss:$8 sps:$4 sm:$0xff]  }
  0x1a   :  { %v1355_v2 = vld [vmem:[%s1933_s3 + $0x344] ss:$8 sps:$4 sm:$0xff]   ;;  %v1350_v3 = vld [vmem:[%s1933_s3 + $0x240] ss:$8 sps:$4 sm:$0xff]   ;;  %v1358_v5 = vld [vmem:[%s1933_s3 + $0x234] ss:$8 sps:$4 sm:$0xff]  }
  0x1b   :  { %949 = vmatpush1.bf16.msra.mxu0 %v1276_v26  ;;  %v133_v20 = vmul.f32 0.2, %v125_v16  ;;  %v135_v24 = vmul.f32 0.2, %v127_v19  ;;  %v1671_v26 = vrot.slane %v1622_v57, %v60_v14  ;;  %v132_v37 = vmul.f32 0.2, %v124_v21 }
  0x1c   :  { %990 = vmatpush1.bf16.msra.mxu1 %v1277_v27  ;;  %950 = vmatprep.subr.bf16.mxu0 %v1278_v28  ;;  %v1674_v27 = vrot.slane %v1627_v58, %v60_v14  ;;  %v1318_v28 = vld [vmem:[%s1933_s3 + $0xa0] ss:$8 sps:$4 sm:$0xff]   ;;  %v1361_v6 = vld [vmem:[%s1933_s3 + $0x334] ss:$8 sps:$4 sm:$0xff]   ;;  %v1356_v7 = vld [vmem:[%s1933_s3 + $0x230] ss:$8 sps:$4 sm:$0xff]  }
  0x1d   :  { %991 = vmatprep.subr.bf16.mxu1 %v1280_v29  ;;  %v1319_v29 = vld [vmem:[%s1933_s3 + $0x1a0] ss:$8 sps:$4 sm:$0xff]   ;;  %v1359_v8 = vld [vmem:[%s1933_s3 + $0x330] ss:$8 sps:$4 sm:$0xff]   ;;  %v56_v11 = vsub.s32 5, %v1585_v42  ;;  %v64_v13 = vsub.s32 7, %v1585_v42 }
  0x1e   :  { %v1362_v12 = vld [vmem:[%s1933_s3 + $0x220] ss:$8 sps:$4 sm:$0xff]   ;;  %v22_v42 = vld [vmem:[%s1934_s0 + $0x10] sm:$0xff] }
  0x1f   :  { %951 = vmatpush1.bf16.msra.mxu0 %v1282_v30  ;;  %v1320_v30 = vld [vmem:[%s1933_s3 + $0x94] ss:$8 sps:$4 sm:$0xff]   ;;  %v1365_v14 = vld [vmem:[%s1933_s3 + $0x320] ss:$8 sps:$4 sm:$0xff]   ;;  %v57_v17 = vrot.slane %v1622_v57, %v56_v11 }
  0x20   :  { %992 = vmatpush1.bf16.msra.mxu1 %v1283_v31  ;;  %952 = vmatprep.subr.bf16.mxu0 %v1284_v32  ;;  %v141_v31 = vmax.f32 %v125_v16, %v133_v20  ;;  %v1322_v32 = vld [vmem:[%s1933_s3 + $0x194] ss:$8 sps:$4 sm:$0xff]   ;;  %v1371_v20 = vld [vmem:[%s1933_s3 + $0x310] ss:$8 sps:$4 sm:$0xff]  }
  0x21   :  { %993 = vmatprep.subr.bf16.mxu1 %v1286_v33  ;;  %v143_v33 = vmax.f32 %v127_v19, %v135_v24  ;;  %v1373_v16 = vld [vmem:[%s1933_s3 + $0x314] ss:$8 sps:$4 sm:$0xff]   ;;  %v1368_v19 = vld [vmem:[%s1933_s3 + $0x210] ss:$8 sps:$4 sm:$0xff]   ;;  %v29_v24 = vunpack.c.h.bf16 %v22_v42 }
  0x23   :  { %953 = vmatpush2.bf16.msra.mxu0 %v1288_v34  ;;  %v1324_v34 = vld [vmem:[%s1933_s3 + $0x90] ss:$8 sps:$4 sm:$0xff]  }
  0x24   :  { %994 = vmatpush2.bf16.msra.mxu1 %v1289_v35  ;;  %954 = vmatprep.subr.bf16.mxu0 %v1290_v36  ;;  %v149_v35 = vpack.c.bf16 %v141_v31, %v141_v31  ;;  %v151_v36 = vpack.c.bf16 %v143_v33, %v143_v33  ;;  %v79_v33 = vmul.f32 %v57_v17, %v29_v24 }
  0x25   :  { %995 = vmatprep.subr.bf16.mxu1 %v1292_v38  ;;  %v134_v38 = vmul.f32 0.2, %v126_v25 }
  0x26   :  { %968 = vmatprep.mubr.bf16.mxu0 %v149_v35  ;;  %1009 = vmatprep.mubr.bf16.mxu1 %v151_v36 }
  0x27   :  { %955 = vmatpush2.bf16.msra.mxu0 %v1294_v39  ;;  %v1325_v39 = vld [vmem:[%s1933_s3 + $0x190] ss:$8 sps:$4 sm:$0xff]  }
  0x28   :  { %996 = vmatpush2.bf16.msra.mxu1 %v1295_v40  ;;  %956 = vmatprep.subr.bf16.mxu0 %v1296_v41  ;;  %v1326_v40 = vld [vmem:[%s1933_s3 + $0x84] ss:$8 sps:$4 sm:$0xff]  }
  0x29   :  { %997 = vmatprep.subr.bf16.mxu1 %v1298_v43  ;;  %v1328_v41 = vld [vmem:[%s1933_s3 + $0x184] ss:$8 sps:$4 sm:$0xff]   ;;  %v1330_v43 = vld [vmem:[%s1933_s3 + $0x80] ss:$8 sps:$4 sm:$0xff]  }
  0x2b   :  { %957 = vmatpush2.bf16.msra.mxu0 %v1300_v44  ;;  %v140_v44 = vmax.f32 %v124_v21, %v132_v37  ;;  %v28_v21 = vunpack.c.l.bf16 %v22_v42  ;;  %v1374_v37 = vld [vmem:[%s1933_s3 + $0x200] ss:$8 sps:$4 sm:$0xff]  }
  0x2c   :  { %998 = vmatpush2.bf16.msra.mxu1 %v1301_v45  ;;  %958 = vmatprep.subr.bf16.mxu0 %v1302_v46  ;;  %v142_v45 = vmax.f32 %v126_v25, %v134_v38  ;;  %v1331_v46 = vld [vmem:[%s1933_s3 + $0x180] ss:$8 sps:$4 sm:$0xff]   ;;  %v107_v25 = vrot.slane %v1627_v58, %v56_v11 }
  0x2d   :  { %999 = vmatprep.subr.bf16.mxu1 %v1304_v48  ;;  %v1334_v48 = vld [vmem:[%s1933_s3 + $0x274] ss:$8 sps:$4 sm:$0xff]   ;;  %v1377_v38 = vld [vmem:[%s1933_s3 + $0x300] ss:$8 sps:$4 sm:$0xff]  }
  0x2f   :  { %959 = vmatpush2.bf16.msra.mxu0 %v1306_v51  ;;  %v148_v51 = vpack.c.bf16 %v140_v44, %v140_v44 }
  0x30   :  { %1000 = vmatpush2.bf16.msra.mxu1 %v1307_v52  ;;  %960 = vmatprep.subr.bf16.mxu0 %v1308_v60  ;;  %v150_v52 = vpack.c.bf16 %v142_v45, %v142_v45  ;;  %v1341_v60 = vld [vmem:[%s1933_s3 + $0x360] ss:$8 sps:$4 sm:$0xff]   ;;  %v1383_v45 = vld [vmem:[%s1933_s3 + $0x3f0] ss:$8 sps:$4 sm:$0xff]  }
  0x31   :  { %1001 = vmatprep.subr.bf16.mxu1 %v1310_v1  ;;  %v1352_v1 = vld [vmem:[%s1933_s3 + $0x244] ss:$8 sps:$4 sm:$0xff]  }
  0x33   :  { %961 = vmatpush2.bf16.msra.mxu0 %v1312_v9  ;;  %v1364_v9 = vld [vmem:[%s1933_s3 + $0x224] ss:$8 sps:$4 sm:$0xff]  }
  0x34   :  { %1002 = vmatpush2.bf16.msra.mxu1 %v1313_v10  ;;  %962 = vmatprep.subr.bf16.mxu0 %v1314_v15  ;;  %v1367_v10 = vld [vmem:[%s1933_s3 + $0x324] ss:$8 sps:$4 sm:$0xff]   ;;  %v1370_v15 = vld [vmem:[%s1933_s3 + $0x214] ss:$8 sps:$4 sm:$0xff]  }
  0x35   :  { %1003 = vmatprep.subr.bf16.mxu1 %v1316_v18  ;;  %v65_v18 = vrot.slane %v1622_v57, %v64_v13  ;;  %v1376_v57 = vld [vmem:[%s1933_s3 + $0x204] ss:$8 sps:$4 sm:$0xff]  }
  0x37   :  { %963 = vmatpush2.bf16.msra.mxu0 %v1318_v28  ;;  %v23_v28 = vld [vmem:[%s1934_s0 + $0x18] sm:$0xff] }
  0x38   :  { %1004 = vmatpush2.bf16.msra.mxu1 %v1319_v29  ;;  %964 = vmatprep.subr.bf16.mxu0 %v1320_v30  ;;  %v1379_v29 = vld [vmem:[%s1933_s3 + $0x304] ss:$8 sps:$4 sm:$0xff]   ;;  %v30_v30 = vunpack.c.l.bf16 %v23_v28  ;;  %v31_v31 = vunpack.c.h.bf16 %v23_v28 }
  0x39   :  { %1005 = vmatprep.subr.bf16.mxu1 %v1322_v32  ;;  %v115_v32 = vrot.slane %v1627_v58, %v64_v13  ;;  %v1382_v58 = vld [vmem:[%s1933_s3 + $0x2f4] ss:$8 sps:$4 sm:$0xff]   ;;  %v1416_v13 = vld [vmem:[%s1933_s3 + $0x290] ss:$8 sps:$4 sm:$0xff]  }
  0x3a   :  { %v81_v35 = vmul.f32 %v65_v18, %v31_v31  ;;  %v80_v36 = vmul.f32 %v1671_v26, %v30_v30  ;;  %v1422_v18 = vld [vmem:[%s1933_s3 + $0x280] ss:$8 sps:$4 sm:$0xff]  }
  0x3b   :  { %965 = vmatpush2.bf16.msra.mxu0 %v1324_v34  ;;  %v78_v34 = vmul.f32 %v1665_v22, %v28_v21  ;;  %v1385_v22 = vld [vmem:[%s1933_s3 + $0x3f4] ss:$8 sps:$4 sm:$0xff]  }
  0x3c   :  { %1006 = vmatpush2.bf16.msra.mxu1 %v1325_v39  ;;  %966 = vmatprep.subr.bf16.mxu0 %v1326_v40  ;;  %v129_v39 = vadd.f32 %v107_v25, %v79_v33  ;;  %v131_v26 = vadd.f32 %v115_v32, %v81_v35  ;;  %v284_v33 = vld [vmem:[%s1937_s4] sm:$0x3] }
  0x3d   :  { %1007 = vmatprep.subr.bf16.mxu1 %v1328_v41  ;;  %v1817_v40 = vadd.f32 %v1668_v23, %v78_v34  ;;  %v1826_v41 = vadd.f32 %v1674_v27, %v80_v36  ;;  %v1380_v23 = vld [vmem:[%s1933_s3 + $0x2f0] ss:$8 sps:$4 sm:$0xff]   ;;  %v1388_v27 = vld [vmem:[%s1933_s3 + $0x2e4] ss:$8 sps:$4 sm:$0xff]   ;;  %v289_v34 = vrot.slane %v284_v33, %v1607_v50  ;;  %v293_v35 = vrot.slane %v284_v33, %v1600_v47 }
  0x3e   :  { %v139_v44 = vmul.f32 0.2, %v131_v26 }
  0x3f   :  { %967 = vmatpush2.bf16.msra.mxu0 %v1330_v43  ;;  %v137_v43 = vmul.f32 0.2, %v129_v39  ;;  %v136_v11 = vmul.f32 0.2, %v1817_v40 }
  0x40   :  { %1008 = vmatpush2.bf16.msra.mxu1 %v1331_v46  ;;  %1018 = vmatprep.subr.bf16.mxu0 %v1334_v48  ;;  %v1391_v48 = vld [vmem:[%s1933_s3 + $0x3e4] ss:$8 sps:$4 sm:$0xff]  }
  0x41   :  { %1059 = vmatprep.subr.bf16.mxu1 %v1337_v49  ;;  %v145_v46 = vmax.f32 %v129_v39, %v137_v43  ;;  %v147_v49 = vmax.f32 %v131_v26, %v139_v44  ;;  %v144_v17 = vmax.f32 %v1817_v40, %v136_v11 }
  0x42   :  { %969 = vmatmul.mubr.bf16.vlgmr.msra.gmra.mxu0 %v148_v51 }
  0x43   :  { %1010 = vmatmul.mubr.bf16.vlgmr.msra.gmra.mxu1 %v150_v52  ;;  %1019 = vmatpush1.bf16.msra.mxu0 %v1332_v53  ;;  %v153_v51 = vpack.c.bf16 %v145_v46, %v145_v46  ;;  %v155_v52 = vpack.c.bf16 %v147_v49, %v147_v49  ;;  %v1386_v53 = vld [vmem:[%s1933_s3 + $0x2e0] ss:$8 sps:$4 sm:$0xff]  }
  0x44   :  { %1060 = vmatpush1.bf16.msra.mxu1 %v1335_v54  ;;  %1020 = vmatprep.subr.bf16.mxu0 %v1340_v55  ;;  %v1389_v54 = vld [vmem:[%s1933_s3 + $0x3e0] ss:$8 sps:$4 sm:$0xff]   ;;  %v1394_v55 = vld [vmem:[%s1933_s3 + $0x2d4] ss:$8 sps:$4 sm:$0xff]  }
  0x45   :  { %1061 = vmatprep.subr.bf16.mxu1 %v1343_v56  ;;  %v1397_v56 = vld [vmem:[%s1933_s3 + $0x3d4] ss:$8 sps:$4 sm:$0xff]   ;;  %1050 = vmatprep.mubr.bf16.mxu0 %v153_v51 }
  0x46   :  { %1091 = vmatprep.mubr.bf16.mxu1 %v155_v52 }
  0x47   :  { %1021 = vmatpush1.bf16.msra.mxu0 %v1338_v59  ;;  %v1392_v59 = vld [vmem:[%s1933_s3 + $0x2d0] ss:$8 sps:$4 sm:$0xff]  }
  0x48   :  { %1062 = vmatpush1.bf16.msra.mxu1 %v1341_v60  ;;  %1022 = vmatprep.subr.bf16.mxu0 %v1346_v61  ;;  %v1395_v60 = vld [vmem:[%s1933_s3 + $0x3d0] ss:$8 sps:$4 sm:$0xff]   ;;  %v1400_v61 = vld [vmem:[%s1933_s3 + $0x2c4] ss:$8 sps:$4 sm:$0xff]  }
  0x49   :  { %1063 = vmatprep.subr.bf16.mxu1 %v1349_v62  ;;  %v1403_v62 = vld [vmem:[%s1933_s3 + $0x3c4] ss:$8 sps:$4 sm:$0xff]  }
  0x4b   :  { %1023 = vmatpush1.bf16.msra.mxu0 %v1344_v63  ;;  %v1398_v63 = vld [vmem:[%s1933_s3 + $0x2c0] ss:$8 sps:$4 sm:$0xff]  }
  0x4c   :  { %1064 = vmatpush1.bf16.msra.mxu1 %v1347_v0  ;;  %1024 = vmatprep.subr.bf16.mxu0 %v1352_v1  ;;  %v1401_v0 = vld [vmem:[%s1933_s3 + $0x3c0] ss:$8 sps:$4 sm:$0xff]   ;;  %v1406_v1 = vld [vmem:[%s1933_s3 + $0x2b4] ss:$8 sps:$4 sm:$0xff]  }
  0x4d   :  { %1065 = vmatprep.subr.bf16.mxu1 %v1355_v2  ;;  %v1409_v2 = vld [vmem:[%s1933_s3 + $0x3b4] ss:$8 sps:$4 sm:$0xff]  }
  0x4f   :  { %1025 = vmatpush1.bf16.msra.mxu0 %v1350_v3  ;;  %v1404_v3 = vld [vmem:[%s1933_s3 + $0x2b0] ss:$8 sps:$4 sm:$0xff]  }
  0x50   :  { %1066 = vmatpush1.bf16.msra.mxu1 %v1353_v4  ;;  %1026 = vmatprep.subr.bf16.mxu0 %v1358_v5  ;;  %v1407_v4 = vld [vmem:[%s1933_s3 + $0x3b0] ss:$8 sps:$4 sm:$0xff]   ;;  %v1412_v5 = vld [vmem:[%s1933_s3 + $0x2a4] ss:$8 sps:$4 sm:$0xff]  }
  0x51   :  { %1067 = vmatprep.subr.bf16.mxu1 %v1361_v6  ;;  %v1415_v6 = vld [vmem:[%s1933_s3 + $0x3a4] ss:$8 sps:$4 sm:$0xff]  }
  0x53   :  { %1027 = vmatpush1.bf16.msra.mxu0 %v1356_v7  ;;  %v1410_v7 = vld [vmem:[%s1933_s3 + $0x2a0] ss:$8 sps:$4 sm:$0xff]  }
  0x54   :  { %1068 = vmatpush1.bf16.msra.mxu1 %v1359_v8  ;;  %1028 = vmatprep.subr.bf16.mxu0 %v1364_v9  ;;  %v1413_v8 = vld [vmem:[%s1933_s3 + $0x3a0] ss:$8 sps:$4 sm:$0xff]   ;;  %v1418_v9 = vld [vmem:[%s1933_s3 + $0x294] ss:$8 sps:$4 sm:$0xff]  }
  0x55   :  { %1069 = vmatprep.subr.bf16.mxu1 %v1367_v10  ;;  %v1421_v10 = vld [vmem:[%s1933_s3 + $0x394] ss:$8 sps:$4 sm:$0xff]  }
  0x57   :  { %1029 = vmatpush1.bf16.msra.mxu0 %v1362_v12  ;;  %v138_v12 = vmul.f32 0.2, %v1826_v41 }
  0x58   :  { %1070 = vmatpush1.bf16.msra.mxu1 %v1365_v14  ;;  %1030 = vmatprep.subr.bf16.mxu0 %v1370_v15  ;;  %v1419_v14 = vld [vmem:[%s1933_s3 + $0x390] ss:$8 sps:$4 sm:$0xff]   ;;  %v1424_v15 = vld [vmem:[%s1933_s3 + $0x284] ss:$8 sps:$4 sm:$0xff]  }
  0x59   :  { %1071 = vmatprep.subr.bf16.mxu1 %v1373_v16  ;;  %v1427_v16 = vld [vmem:[%s1933_s3 + $0x384] ss:$8 sps:$4 sm:$0xff]   ;;  %v146_v42 = vmax.f32 %v1826_v41, %v138_v12 }
  0x5b   :  { %1031 = vmatpush1.bf16.msra.mxu0 %v1368_v19  ;;  %v1425_v19 = vld [vmem:[%s1933_s3 + $0x380] ss:$8 sps:$4 sm:$0xff]   ;;  %v154_v21 = vpack.c.bf16 %v146_v42, %v146_v42 }
  0x5c   :  { %1072 = vmatpush1.bf16.msra.mxu1 %v1371_v20  ;;  %1032 = vmatprep.subr.bf16.mxu0 %v1376_v57  ;;  %v152_v20 = vpack.c.bf16 %v144_v17, %v144_v17 }
  0x5d   :  { %1073 = vmatprep.subr.bf16.mxu1 %v1379_v29 }
  0x5f   :  { %1033 = vmatpush1.bf16.msra.mxu0 %v1374_v37 }
  0x60   :  { %1074 = vmatpush1.bf16.msra.mxu1 %v1377_v38  ;;  %1034 = vmatprep.subr.bf16.mxu0 %v1382_v58 }
  0x61   :  { %1075 = vmatprep.subr.bf16.mxu1 %v1385_v22 }
  0x63   :  { %1035 = vmatpush2.bf16.msra.mxu0 %v1380_v23 }
  0x64   :  { %1076 = vmatpush2.bf16.msra.mxu1 %v1383_v45  ;;  %1036 = vmatprep.subr.bf16.mxu0 %v1388_v27 }
  0x65   :  { %1077 = vmatprep.subr.bf16.mxu1 %v1391_v48 }
  0x67   :  { %1037 = vmatpush2.bf16.msra.mxu0 %v1386_v53 }
  0x68   :  { %1078 = vmatpush2.bf16.msra.mxu1 %v1389_v54  ;;  %1038 = vmatprep.subr.bf16.mxu0 %v1394_v55 }
  0x69   :  { %1079 = vmatprep.subr.bf16.mxu1 %v1397_v56 }
  0x6b   :  { %1039 = vmatpush2.bf16.msra.mxu0 %v1392_v59 }
  0x6c   :  { %1080 = vmatpush2.bf16.msra.mxu1 %v1395_v60  ;;  %1040 = vmatprep.subr.bf16.mxu0 %v1400_v61 }
  0x6d   :  { %1081 = vmatprep.subr.bf16.mxu1 %v1403_v62 }
  0x6f   :  { %1041 = vmatpush2.bf16.msra.mxu0 %v1398_v63 }
  0x70   :  { %1082 = vmatpush2.bf16.msra.mxu1 %v1401_v0  ;;  %1042 = vmatprep.subr.bf16.mxu0 %v1406_v1 }
  0x71   :  { %1083 = vmatprep.subr.bf16.mxu1 %v1409_v2 }
  0x73   :  { %1043 = vmatpush2.bf16.msra.mxu0 %v1404_v3 }
  0x74   :  { %1084 = vmatpush2.bf16.msra.mxu1 %v1407_v4  ;;  %1044 = vmatprep.subr.bf16.mxu0 %v1412_v5 }
  0x75   :  { %1085 = vmatprep.subr.bf16.mxu1 %v1415_v6 }
  0x77   :  { %1045 = vmatpush2.bf16.msra.mxu0 %v1410_v7 }
  0x78   :  { %1086 = vmatpush2.bf16.msra.mxu1 %v1413_v8  ;;  %1046 = vmatprep.subr.bf16.mxu0 %v1418_v9 }
  0x79   :  { %1087 = vmatprep.subr.bf16.mxu1 %v1421_v10 }
  0x7b   :  { %1047 = vmatpush2.bf16.msra.mxu0 %v1416_v13 }
  0x7c   :  { %1088 = vmatpush2.bf16.msra.mxu1 %v1419_v14  ;;  %1048 = vmatprep.subr.bf16.mxu0 %v1424_v15 }
  0x7d   :  { %1089 = vmatprep.subr.bf16.mxu1 %v1427_v16 }
  0x7f   :  { %1049 = vmatpush2.bf16.msra.mxu0 %v1422_v18 }
  0x80   :  { %1090 = vmatpush2.bf16.msra.mxu1 %v1425_v19 }
  0x82   :  { %1051 = vmatmul.mubr.bf16.vlgmr.msra.gmra.mxu0 %v152_v20 }
  0x83   :  { %1092 = vmatmul.mubr.bf16.vlgmr.msra.gmra.mxu1 %v154_v21 }
 0x102   :  { %v970_v24 = vpop.f32.mrf.mxu0 }
 0x103   :  { %v1011_v25 = vpop.f32.mrf.mxu1  ;;  %v971_v36 = vadd.f32 %v970_v24, %v289_v34 }
 0x104   :  { %v972_v28 = vpop.f32.mrf.mxu0 }
 0x105   :  { %v1013_v57 = vpop.f32.mrf.mxu1  ;;  %v973_v37 = vadd.f32 %v972_v28, %v293_v35  ;;  %v1012_v38 = vadd.f32 %v1011_v25, %v971_v36 }
 0x106   :  { %v974_v29 = vpop.f32.mrf.mxu0 }
 0x107   :  { %v1015_v30 = vpop.f32.mrf.mxu1  ;;  %v1014_v58 = vadd.f32 %v1013_v57, %v973_v37 }
 0x108   :  { %v975_v31 = vpop.f32.mrf.mxu0 }
 0x109   :  { %v1016_v32 = vpop.f32.mrf.mxu1 }
 0x142   :  { %v1052_v39 = vpop.f32.mrf.mxu0 }
 0x143   :  { %v1093_v40 = vpop.f32.mrf.mxu1  ;;  %v1053_v22 = vadd.f32 %v1052_v39, %v1012_v38 }
 0x144   :  { %v1054_v26 = vpop.f32.mrf.mxu0 }
 0x145   :  { %v1095_v41 = vpop.f32.mrf.mxu1  ;;  %v1094_v43 = vadd.f32 %v1093_v40, %v1053_v22  ;;  %v1055_v44 = vadd.f32 %v1054_v26, %v1014_v58 }
 0x146   :  { %v1056_v23 = vpop.f32.mrf.mxu0 }
 0x147   :  { %v1097_v45 = vpop.f32.mrf.mxu1  ;;  %1428 = vtanh.f32 %v1094_v43  ;;  %v1096_v46 = vadd.f32 %v1095_v41, %v1055_v44 }
 0x148   :  { %v1057_v27 = vpop.f32.mrf.mxu0 }
 0x149   :  { %v1098_v48 = vpop.f32.mrf.mxu1  ;;  %1430 = vtanh.f32 %v1096_v46 }
 0x154   :  { %v1429_v50 = vpop.eup %1428 }
 0x155   :  { %1102 = vst [vmem:[%s1938_s5] sm:$0xff] %v1429_v50 }
 0x156   :  { %v1431_v47 = vpop.eup %1430 }
 0x157   :  { %1103 = vst [vmem:[%s1938_s5 + $0x8] sm:$0xff] %v1431_v47 }

</bundles_post_ra>
